<compile_context>
chip_gen: v6e
topology: v6e:2x2x1
jax: 0.10.0
libtpu: 0.0.40
codegen_flags: <defaults>
</compile_context>

<pallas_src>
import functools

import jax
import jax.numpy as jnp
from jax import lax
from jax.experimental import pallas as pl
from jax.experimental.pallas import tpu as pltpu

# Fixed architecture constants of ModifiedSimpleCNN.
CIN = 4                       # input channels
K1, C1, P1 = 9, 16, 4         # conv1: kernel 9, 16 out channels, pad 4
K2, C2, P2 = 3, 32, 1         # conv2: kernel 3, 32 out channels, pad 1
POOL1, POOL2 = 5, 2
H = 64                        # fc1 hidden size
F1 = K1 * CIN                 # conv1 im2col features = 36
F2C = K2 * C1                 # conv2 packed features = 48


def _round_up(v, m):
    return (v + m - 1) // m * m


def prepare_params(params, seq_length):
    """One-time parameter re-layout (hoisted out of the per-call path)."""
    L1 = seq_length // POOL1
    L2 = L1 // POOL2
    # conv1 -> (16, 36) with column k*CIN + ci (matches im2col feature order).
    w1t = jnp.transpose(params["conv1_w"], (0, 2, 1)).reshape(C1, F1)
    # conv2 -> packed (32, 48): columns [tap k][in channel ci] = k*16 + ci,
    # taps ordered (p-1, p, p+1) = kernel index 0, 1, 2.
    w2p = jnp.transpose(params["conv2_w"], (0, 2, 1)).reshape(C2, F2C)
    # fc1 weight permuted so our (q, c)-ordered flatten matches PyTorch's
    # channel-major `.view(-1, 32*L2)`: wf1[h, q*32 + c] = fc1_w[h, c*L2 + q].
    wf1 = jnp.transpose(params["fc1_w"].reshape(H, C2, L2),
                        (0, 2, 1)).reshape(H, L2 * C2)
    return dict(
        w1t=w1t, b1=params["conv1_b"].reshape(C1, 1),
        w2p=w2p, b2=params["conv2_b"].reshape(C2, 1),
        wf1=wf1, bf1=params["fc1_b"].reshape(H, 1),
        wf2=params["fc2_w"].reshape(1, H), bf2=params["fc2_b"].reshape(1, 1),
    )


@functools.partial(jax.jit, static_argnames=("block_b",))
def modified_simple_cnn_forward(x, prep, *, block_b=512):
    """x: (B, L, 4) float32 channels-last (module input before its permute).

    Returns (B, 1) float32.
    """
    B, L, cin = x.shape
    assert cin == CIN
    assert L % (POOL1 * POOL2) == 0
    L1 = L // POOL1
    L2 = L1 // POOL2
    F2 = L2 * C2
    assert prep["wf1"].shape == (H, F2), "prepare_params seq_length mismatch"

    # ---- batch tile selection (multiple of 128: lane-dense, aligned shifts) --
    blk = max(128, _round_up(block_b, 128))
    TB = min(blk, _round_up(B, 128))
    if _round_up(B, 128) >= 256:
        # Keep >= 2 grid blocks so v7x's two TensorCores both get work.
        TB = min(TB, _round_up(pl.cdiv(B, 2), 128))
    # VMEM cap: double-buffered im2col block (36->40 sublane pad) + live acts.
    per_sample = 4 * L1 * (2 * POOL1 * _round_up(F1, 8) + 160)
    TB = min(TB, max(128, (28 << 20) // per_sample // 128 * 128))
    NB = pl.cdiv(B, TB)
    Bp = NB * TB
    NL = L1 * TB                                   # lane extent of a batch block

    in_block_bytes = POOL1 * _round_up(F1, 8) * NL * 4
    act_bytes = (2 * C1 + F2C + 2 * C2 + 8) * NL * 4
    vmem_limit = int(min(60 << 20,
                         max(32 << 20, 2 * in_block_bytes + act_bytes + (8 << 20))))

    # ---- conv1 im2col, pool1-phase-major, batch-minor-on-lanes (wrapper/XLA) --
    # pat[bb*5 + j, k*4 + ci, p*TB + b] = x_pad[bb*TB + b, 5*p + j + k, ci]
    x_pad = jnp.pad(x, ((0, Bp - B), (P1, P1), (0, 0)))               # (Bp, L+8, 4)
    pat = jnp.stack([x_pad[:, k:k + L, :] for k in range(K1)], axis=2)  # (Bp, L, 9, 4)
    pat = pat.reshape(NB, TB, L1, POOL1, F1)                          # l = 5*p + j
    pat = jnp.transpose(pat, (0, 3, 4, 2, 1))                         # (NB, 5, 36, L1, TB)
    pat = pat.reshape(NB * POOL1, F1, NL)

    # TODO(synk): nn.Dropout has no inference-time effect; train-mode stochastic
    # masking is intentionally not implemented (eval semantics).

    def kernel(pat_ref, w1t_ref, b1_ref, w2p_ref, b2_ref,
               wf1_ref, bf1_ref, wf2_ref, bf2_ref, out_ref):
        # ---- conv1 (k=9) as one K=36 matmul per pool1 phase; pool1 = 4 maxes --
        w1t = w1t_ref[...]                                            # (16, 36)
        m = jnp.dot(w1t, pat_ref[0], preferred_element_type=jnp.float32)
        for j in range(1, POOL1):
            m = jnp.maximum(m, jnp.dot(w1t, pat_ref[j],
                                       preferred_element_type=jnp.float32))
        h1 = jnp.maximum(m + b1_ref[...], 0.0)                        # (16, NL)
        # conv_dropout: identity at inference.

        # ---- conv2 (k=3, pad=1): neighbours are whole-TB lane-block shifts ---
        # (batch is the minor lane index -> no cross-sample leakage, no masks)
        zblk = jnp.zeros((C1, TB), jnp.float32)
        left = jnp.concatenate([zblk, h1[:, :NL - TB]], axis=1)       # input @ p-1
        right = jnp.concatenate([h1[:, TB:], zblk], axis=1)           # input @ p+1
        pat2 = jnp.concatenate([left, h1, right], axis=0)             # (48, NL)
        h2 = jnp.dot(w2p_ref[...], pat2, preferred_element_type=jnp.float32)
        h2 = jnp.maximum(h2 + b2_ref[...], 0.0)                       # (32, NL)

        # ---- max_pool1d(2) fused with channel-major flatten ------------------
        # L2 aligned lane-block slices + maxes, one sublane concat -> (L2*32, TB)
        flat = jnp.concatenate(
            [jnp.maximum(h2[:, (2 * q) * TB:(2 * q + 1) * TB],
                         h2[:, (2 * q + 1) * TB:(2 * q + 2) * TB])
             for q in range(L2)], axis=0)

        # ---- fc1 + relu, fc2 (lane-dense (1, TB) output row) -----------------
        hf = jnp.dot(wf1_ref[...], flat, preferred_element_type=jnp.float32)
        hf = jnp.maximum(hf + bf1_ref[...], 0.0)                      # (64, TB)
        # fc_dropout: identity at inference.
        out_ref[...] = (jnp.dot(wf2_ref[...], hf,
                                preferred_element_type=jnp.float32)
                        + bf2_ref[...])                               # (1, TB)

    out = pl.pallas_call(
        kernel,
        out_shape=jax.ShapeDtypeStruct((NB, TB), jnp.float32),
        grid=(NB,),
        in_specs=[
            pl.BlockSpec((POOL1, F1, NL), lambda b: (b, 0, 0)),
            pl.BlockSpec((C1, F1), lambda b: (0, 0)),
            pl.BlockSpec((C1, 1), lambda b: (0, 0)),
            pl.BlockSpec((C2, F2C), lambda b: (0, 0)),
            pl.BlockSpec((C2, 1), lambda b: (0, 0)),
            pl.BlockSpec((H, F2), lambda b: (0, 0)),
            pl.BlockSpec((H, 1), lambda b: (0, 0)),
            pl.BlockSpec((1, H), lambda b: (0, 0)),
            pl.BlockSpec((1, 1), lambda b: (0, 0)),
        ],
        out_specs=pl.BlockSpec((1, TB), lambda b: (b, 0)),
        compiler_params=pltpu.CompilerParams(
            dimension_semantics=("parallel",),
            vmem_limit_bytes=vmem_limit),
    )(pat, prep["w1t"], prep["b1"], prep["w2p"], prep["b2"],
      prep["wf1"], prep["bf1"], prep["wf2"], prep["bf2"])

    return out.reshape(Bp, 1)[:B]


def ref_forward(x, params):
    """Pure-JAX reference mirroring the PyTorch forward (eval mode)."""
    xc = jnp.transpose(x, (0, 2, 1))                                   # (B, 4, L)
    y = lax.conv_general_dilated(xc, params["conv1_w"], (1,), [(4, 4)],
                                 dimension_numbers=("NCH", "OIH", "NCH"))
    y = jax.nn.relu(y + params["conv1_b"][None, :, None])
    B, C, Lc = y.shape
    y = y.reshape(B, C, Lc // 5, 5).max(axis=-1)                       # max_pool1d(5)
    y = lax.conv_general_dilated(y, params["conv2_w"], (1,), [(1, 1)],
                                 dimension_numbers=("NCH", "OIH", "NCH"))
    y = jax.nn.relu(y + params["conv2_b"][None, :, None])
    B, C, Lc = y.shape
    y = y.reshape(B, C, Lc // 2, 2).max(axis=-1)                       # max_pool1d(2)
    flat = y.reshape(B, -1)                                            # channel-major view
    h = jax.nn.relu(flat @ params["fc1_w"].T + params["fc1_b"])
    return h @ params["fc2_w"].T + params["fc2_b"]


if __name__ == "__main__":
    def make_params(key, L):
        L2 = L // POOL1 // POOL2
        ks = jax.random.split(key, 8)
        return {
            "conv1_w": 0.1 * jax.random.normal(ks[0], (C1, CIN, K1), jnp.float32),
            "conv1_b": 0.1 * jax.random.normal(ks[1], (C1,), jnp.float32),
            "conv2_w": 0.1 * jax.random.normal(ks[2], (C2, C1, K2), jnp.float32),
            "conv2_b": 0.1 * jax.random.normal(ks[3], (C2,), jnp.float32),
            "fc1_w": 0.1 * jax.random.normal(ks[4], (H, C2 * L2), jnp.float32),
            "fc1_b": 0.1 * jax.random.normal(ks[5], (H,), jnp.float32),
            "fc2_w": 0.1 * jax.random.normal(ks[6], (1, H), jnp.float32),
            "fc2_b": 0.1 * jax.random.normal(ks[7], (1,), jnp.float32),
        }

    key = jax.random.PRNGKey(0)
    # (single-block small case, default block_b) and (multi-block case, L=100)
    for (B, L, bb) in ((8, 40, 512), (300, 100, 128)):
        kp, kx, key = jax.random.split(key, 3)
        params = make_params(kp, L)
        x = jax.random.normal(kx, (B, L, CIN), jnp.float32)
        prep = prepare_params(params, seq_length=L)     # one-time re-layout
        out = jax.block_until_ready(
            modified_simple_cnn_forward(x, prep, block_b=bb))
        ref = ref_forward(x, params)
        assert out.shape == (B, 1), out.shape
        err = float(jnp.max(jnp.abs(out - ref)))
        assert jnp.allclose(out, ref, rtol=2e-3, atol=2e-3), (B, L, bb, err)

    print("KERNEL_OK")
</pallas_src>

<mosaic_0001>
module attributes {stable_mosaic.version = 11 : i64} {
  func.func @kernel(%arg0: i32, %arg1: memref<5x36x1024xf32, #tpu.memory_space<vmem>>, %arg2: memref<16x36xf32, #tpu.memory_space<vmem>>, %arg3: memref<16x1xf32, #tpu.memory_space<vmem>>, %arg4: memref<32x48xf32, #tpu.memory_space<vmem>>, %arg5: memref<32x1xf32, #tpu.memory_space<vmem>>, %arg6: memref<64x128xf32, #tpu.memory_space<vmem>>, %arg7: memref<64x1xf32, #tpu.memory_space<vmem>>, %arg8: memref<1x64xf32, #tpu.memory_space<vmem>>, %arg9: memref<1x1xf32, #tpu.memory_space<vmem>>, %arg10: memref<1x128xf32, #tpu.memory_space<vmem>>) attributes {dimension_semantics = [#tpu.dimension_semantics<parallel>], iteration_bounds = array<i64: 1>, scalar_prefetch = 0 : i64, scratch_operands = 0 : i64, tpu.core_type = #tpu.core_type<tc>, window_params = [{transform_indices = @transform_0, window_bounds = array<i64: 5, 36, 1024>}, {pipeline_mode = #tpu.pipeline_mode<synchronous>, transform_indices = @transform_1, window_bounds = array<i64: 16, 36>}, {pipeline_mode = #tpu.pipeline_mode<synchronous>, transform_indices = @transform_2, window_bounds = array<i64: 16, 1>}, {pipeline_mode = #tpu.pipeline_mode<synchronous>, transform_indices = @transform_3, window_bounds = array<i64: 32, 48>}, {pipeline_mode = #tpu.pipeline_mode<synchronous>, transform_indices = @transform_4, window_bounds = array<i64: 32, 1>}, {pipeline_mode = #tpu.pipeline_mode<synchronous>, transform_indices = @transform_5, window_bounds = array<i64: 64, 128>}, {pipeline_mode = #tpu.pipeline_mode<synchronous>, transform_indices = @transform_6, window_bounds = array<i64: 64, 1>}, {pipeline_mode = #tpu.pipeline_mode<synchronous>, transform_indices = @transform_7, window_bounds = array<i64: 1, 64>}, {pipeline_mode = #tpu.pipeline_mode<synchronous>, transform_indices = @transform_8, window_bounds = array<i64: 1, 1>}, {transform_indices = @transform_9, window_bounds = array<i64: 1, 128>}]} {
    %c0 = arith.constant 0 : index
    %c0_0 = arith.constant 0 : index
    %0 = vector.load %arg2[%c0, %c0_0] : memref<16x36xf32, #tpu.memory_space<vmem>>, vector<16x36xf32>
    %c0_1 = arith.constant 0 : index
    %c0_2 = arith.constant 0 : index
    %c0_3 = arith.constant 0 : index
    %1 = vector.load %arg1[%c0_1, %c0_2, %c0_3] : memref<5x36x1024xf32, #tpu.memory_space<vmem>>, vector<1x36x1024xf32>
    %2 = vector.shape_cast %1 : vector<1x36x1024xf32> to vector<36x1024xf32>
    %cst = arith.constant dense<0.000000e+00> : vector<16x1024xf32>
    %3 = tpu.matmul %0, %2, %cst {dimension_numbers = #tpu.dot_dimension_numbers<[1], [0], [0], [1], [0, 0, 1, 1], [], []>} : vector<16x36xf32>, vector<36x1024xf32>, vector<16x1024xf32> -> vector<16x1024xf32>
    %c1 = arith.constant 1 : index
    %c0_4 = arith.constant 0 : index
    %c0_5 = arith.constant 0 : index
    %4 = vector.load %arg1[%c1, %c0_4, %c0_5] : memref<5x36x1024xf32, #tpu.memory_space<vmem>>, vector<1x36x1024xf32>
    %5 = vector.shape_cast %4 : vector<1x36x1024xf32> to vector<36x1024xf32>
    %cst_6 = arith.constant dense<0.000000e+00> : vector<16x1024xf32>
    %6 = tpu.matmul %0, %5, %cst_6 {dimension_numbers = #tpu.dot_dimension_numbers<[1], [0], [0], [1], [0, 0, 1, 1], [], []>} : vector<16x36xf32>, vector<36x1024xf32>, vector<16x1024xf32> -> vector<16x1024xf32>
    %7 = arith.maximumf %3, %6 : vector<16x1024xf32>
    %c2 = arith.constant 2 : index
    %c0_7 = arith.constant 0 : index
    %c0_8 = arith.constant 0 : index
    %8 = vector.load %arg1[%c2, %c0_7, %c0_8] : memref<5x36x1024xf32, #tpu.memory_space<vmem>>, vector<1x36x1024xf32>
    %9 = vector.shape_cast %8 : vector<1x36x1024xf32> to vector<36x1024xf32>
    %cst_9 = arith.constant dense<0.000000e+00> : vector<16x1024xf32>
    %10 = tpu.matmul %0, %9, %cst_9 {dimension_numbers = #tpu.dot_dimension_numbers<[1], [0], [0], [1], [0, 0, 1, 1], [], []>} : vector<16x36xf32>, vector<36x1024xf32>, vector<16x1024xf32> -> vector<16x1024xf32>
    %11 = arith.maximumf %7, %10 : vector<16x1024xf32>
    %c3 = arith.constant 3 : index
    %c0_10 = arith.constant 0 : index
    %c0_11 = arith.constant 0 : index
    %12 = vector.load %arg1[%c3, %c0_10, %c0_11] : memref<5x36x1024xf32, #tpu.memory_space<vmem>>, vector<1x36x1024xf32>
    %13 = vector.shape_cast %12 : vector<1x36x1024xf32> to vector<36x1024xf32>
    %cst_12 = arith.constant dense<0.000000e+00> : vector<16x1024xf32>
    %14 = tpu.matmul %0, %13, %cst_12 {dimension_numbers = #tpu.dot_dimension_numbers<[1], [0], [0], [1], [0, 0, 1, 1], [], []>} : vector<16x36xf32>, vector<36x1024xf32>, vector<16x1024xf32> -> vector<16x1024xf32>
    %15 = arith.maximumf %11, %14 : vector<16x1024xf32>
    %c4 = arith.constant 4 : index
    %c0_13 = arith.constant 0 : index
    %c0_14 = arith.constant 0 : index
    %16 = vector.load %arg1[%c4, %c0_13, %c0_14] : memref<5x36x1024xf32, #tpu.memory_space<vmem>>, vector<1x36x1024xf32>
    %17 = vector.shape_cast %16 : vector<1x36x1024xf32> to vector<36x1024xf32>
    %cst_15 = arith.constant dense<0.000000e+00> : vector<16x1024xf32>
    %18 = tpu.matmul %0, %17, %cst_15 {dimension_numbers = #tpu.dot_dimension_numbers<[1], [0], [0], [1], [0, 0, 1, 1], [], []>} : vector<16x36xf32>, vector<36x1024xf32>, vector<16x1024xf32> -> vector<16x1024xf32>
    %19 = arith.maximumf %15, %18 : vector<16x1024xf32>
    %c0_16 = arith.constant 0 : index
    %c0_17 = arith.constant 0 : index
    %20 = vector.load %arg3[%c0_16, %c0_17] : memref<16x1xf32, #tpu.memory_space<vmem>>, vector<16x1xf32>
    %21 = vector.broadcast %20 : vector<16x1xf32> to vector<16x1024xf32>
    %22 = arith.addf %19, %21 : vector<16x1024xf32>
    %cst_18 = arith.constant 0.000000e+00 : f32
    %23 = vector.broadcast %cst_18 : f32 to vector<16x1024xf32>
    %24 = arith.maximumf %22, %23 : vector<16x1024xf32>
    %cst_19 = arith.constant 0.000000e+00 : f32
    %25 = vector.broadcast %cst_19 : f32 to vector<16x128xf32>
    %26 = vector.extract_strided_slice %24 {offsets = [0, 0], sizes = [16, 896], strides = [1, 1]} : vector<16x1024xf32> to vector<16x896xf32>
    %27 = tpu.concatenate %25, %26 in 1 : vector<16x128xf32>, vector<16x896xf32> -> vector<16x1024xf32>
    %28 = vector.extract_strided_slice %24 {offsets = [0, 128], sizes = [16, 896], strides = [1, 1]} : vector<16x1024xf32> to vector<16x896xf32>
    %29 = tpu.concatenate %28, %25 in 1 : vector<16x896xf32>, vector<16x128xf32> -> vector<16x1024xf32>
    %30 = tpu.concatenate %27, %24, %29 in 0 : vector<16x1024xf32>, vector<16x1024xf32>, vector<16x1024xf32> -> vector<48x1024xf32>
    %c0_20 = arith.constant 0 : index
    %c0_21 = arith.constant 0 : index
    %31 = vector.load %arg4[%c0_20, %c0_21] : memref<32x48xf32, #tpu.memory_space<vmem>>, vector<32x48xf32>
    %cst_22 = arith.constant dense<0.000000e+00> : vector<32x1024xf32>
    %32 = tpu.matmul %31, %30, %cst_22 {dimension_numbers = #tpu.dot_dimension_numbers<[1], [0], [0], [1], [0, 0, 1, 1], [], []>} : vector<32x48xf32>, vector<48x1024xf32>, vector<32x1024xf32> -> vector<32x1024xf32>
    %c0_23 = arith.constant 0 : index
    %c0_24 = arith.constant 0 : index
    %33 = vector.load %arg5[%c0_23, %c0_24] : memref<32x1xf32, #tpu.memory_space<vmem>>, vector<32x1xf32>
    %34 = vector.broadcast %33 : vector<32x1xf32> to vector<32x1024xf32>
    %35 = arith.addf %32, %34 : vector<32x1024xf32>
    %cst_25 = arith.constant 0.000000e+00 : f32
    %36 = vector.broadcast %cst_25 : f32 to vector<32x1024xf32>
    %37 = arith.maximumf %35, %36 : vector<32x1024xf32>
    %38 = vector.extract_strided_slice %37 {offsets = [0, 0], sizes = [32, 128], strides = [1, 1]} : vector<32x1024xf32> to vector<32x128xf32>
    %39 = vector.extract_strided_slice %37 {offsets = [0, 128], sizes = [32, 128], strides = [1, 1]} : vector<32x1024xf32> to vector<32x128xf32>
    %40 = arith.maximumf %38, %39 : vector<32x128xf32>
    %41 = vector.extract_strided_slice %37 {offsets = [0, 256], sizes = [32, 128], strides = [1, 1]} : vector<32x1024xf32> to vector<32x128xf32>
    %42 = vector.extract_strided_slice %37 {offsets = [0, 384], sizes = [32, 128], strides = [1, 1]} : vector<32x1024xf32> to vector<32x128xf32>
    %43 = arith.maximumf %41, %42 : vector<32x128xf32>
    %44 = vector.extract_strided_slice %37 {offsets = [0, 512], sizes = [32, 128], strides = [1, 1]} : vector<32x1024xf32> to vector<32x128xf32>
    %45 = vector.extract_strided_slice %37 {offsets = [0, 640], sizes = [32, 128], strides = [1, 1]} : vector<32x1024xf32> to vector<32x128xf32>
    %46 = arith.maximumf %44, %45 : vector<32x128xf32>
    %47 = vector.extract_strided_slice %37 {offsets = [0, 768], sizes = [32, 128], strides = [1, 1]} : vector<32x1024xf32> to vector<32x128xf32>
    %48 = vector.extract_strided_slice %37 {offsets = [0, 896], sizes = [32, 128], strides = [1, 1]} : vector<32x1024xf32> to vector<32x128xf32>
    %49 = arith.maximumf %47, %48 : vector<32x128xf32>
    %50 = tpu.concatenate %40, %43, %46, %49 in 0 : vector<32x128xf32>, vector<32x128xf32>, vector<32x128xf32>, vector<32x128xf32> -> vector<128x128xf32>
    %c0_26 = arith.constant 0 : index
    %c0_27 = arith.constant 0 : index
    %51 = vector.load %arg6[%c0_26, %c0_27] : memref<64x128xf32, #tpu.memory_space<vmem>>, vector<64x128xf32>
    %cst_28 = arith.constant dense<0.000000e+00> : vector<64x128xf32>
    %52 = tpu.matmul %51, %50, %cst_28 {dimension_numbers = #tpu.dot_dimension_numbers<[1], [0], [0], [1], [0, 0, 1, 1], [], []>} : vector<64x128xf32>, vector<128x128xf32>, vector<64x128xf32> -> vector<64x128xf32>
    %c0_29 = arith.constant 0 : index
    %c0_30 = arith.constant 0 : index
    %53 = vector.load %arg7[%c0_29, %c0_30] : memref<64x1xf32, #tpu.memory_space<vmem>>, vector<64x1xf32>
    %54 = vector.broadcast %53 : vector<64x1xf32> to vector<64x128xf32>
    %55 = arith.addf %52, %54 : vector<64x128xf32>
    %cst_31 = arith.constant 0.000000e+00 : f32
    %56 = vector.broadcast %cst_31 : f32 to vector<64x128xf32>
    %57 = arith.maximumf %55, %56 : vector<64x128xf32>
    %c0_32 = arith.constant 0 : index
    %c0_33 = arith.constant 0 : index
    %58 = vector.load %arg8[%c0_32, %c0_33] : memref<1x64xf32, #tpu.memory_space<vmem>>, vector<1x64xf32>
    %cst_34 = arith.constant dense<0.000000e+00> : vector<1x128xf32>
    %59 = tpu.matmul %58, %57, %cst_34 {dimension_numbers = #tpu.dot_dimension_numbers<[1], [0], [0], [1], [0, 0, 1, 1], [], []>} : vector<1x64xf32>, vector<64x128xf32>, vector<1x128xf32> -> vector<1x128xf32>
    %c0_35 = arith.constant 0 : index
    %c0_36 = arith.constant 0 : index
    %60 = vector.load %arg9[%c0_35, %c0_36] : memref<1x1xf32, #tpu.memory_space<vmem>>, vector<1x1xf32>
    %61 = vector.broadcast %60 : vector<1x1xf32> to vector<1x128xf32>
    %62 = arith.addf %59, %61 : vector<1x128xf32>
    %c0_37 = arith.constant 0 : index
    %c0_38 = arith.constant 0 : index
    %63 = vector.load %arg10[%c0_37, %c0_38] : memref<1x128xf32, #tpu.memory_space<vmem>>, vector<1x128xf32>
    tpu.vector_store %arg10[%c0_37, %c0_38], %62 {strides = array<i32>} : memref<1x128xf32, #tpu.memory_space<vmem>>, vector<1x128xf32>,
    return
  }
  func.func @transform_0(%arg0: i32) -> (i32, i32, i32) {
    %c0_i32 = arith.constant 0 : i32
    %c0_i32_0 = arith.constant 0 : i32
    %c0_i32_1 = arith.constant 0 : i32
    return %arg0, %c0_i32, %c0_i32_0 : i32, i32, i32
  }
  func.func @transform_1(%arg0: i32) -> (i32, i32) {
    %c0_i32 = arith.constant 0 : i32
    %c0_i32_0 = arith.constant 0 : i32
    %c0_i32_1 = arith.constant 0 : i32
    return %c0_i32, %c0_i32_0 : i32, i32
  }
  func.func @transform_2(%arg0: i32) -> (i32, i32) {
    %c0_i32 = arith.constant 0 : i32
    %c0_i32_0 = arith.constant 0 : i32
    %c0_i32_1 = arith.constant 0 : i32
    return %c0_i32, %c0_i32_0 : i32, i32
  }
  func.func @transform_3(%arg0: i32) -> (i32, i32) {
    %c0_i32 = arith.constant 0 : i32
    %c0_i32_0 = arith.constant 0 : i32
    %c0_i32_1 = arith.constant 0 : i32
    return %c0_i32, %c0_i32_0 : i32, i32
  }
  func.func @transform_4(%arg0: i32) -> (i32, i32) {
    %c0_i32 = arith.constant 0 : i32
    %c0_i32_0 = arith.constant 0 : i32
    %c0_i32_1 = arith.constant 0 : i32
    return %c0_i32, %c0_i32_0 : i32, i32
  }
  func.func @transform_5(%arg0: i32) -> (i32, i32) {
    %c0_i32 = arith.constant 0 : i32
    %c0_i32_0 = arith.constant 0 : i32
    %c0_i32_1 = arith.constant 0 : i32
    return %c0_i32, %c0_i32_0 : i32, i32
  }
  func.func @transform_6(%arg0: i32) -> (i32, i32) {
    %c0_i32 = arith.constant 0 : i32
    %c0_i32_0 = arith.constant 0 : i32
    %c0_i32_1 = arith.constant 0 : i32
    return %c0_i32, %c0_i32_0 : i32, i32
  }
  func.func @transform_7(%arg0: i32) -> (i32, i32) {
    %c0_i32 = arith.constant 0 : i32
    %c0_i32_0 = arith.constant 0 : i32
    %c0_i32_1 = arith.constant 0 : i32
    return %c0_i32, %c0_i32_0 : i32, i32
  }
  func.func @transform_8(%arg0: i32) -> (i32, i32) {
    %c0_i32 = arith.constant 0 : i32
    %c0_i32_0 = arith.constant 0 : i32
    %c0_i32_1 = arith.constant 0 : i32
    return %c0_i32, %c0_i32_0 : i32, i32
  }
  func.func @transform_9(%arg0: i32) -> (i32, i32) {
    %c0_i32 = arith.constant 0 : i32
    %c0_i32_0 = arith.constant 0 : i32
    return %arg0, %c0_i32 : i32, i32
  }
}

</mosaic_0001>

<bundles_post_ra>
// kernel: modified_simple_cnn_forward.1
= control target key start
LH: loop header
LB: loop body
LE: loop exit
PB: predicated region body
PF: predicated region fallthrough
CT: control target
= control target key end

     0   :  { %vm83_vm0 = vcmask 1043456   ;;  %v4367_v3 = vmov 0.0   ;;  %vm76_vm1 = vcmask 293888   ;;  %vm2044_vm2 = vcmask 392192   ;;  %s4357_s0 = inlined_call_operand.vmem [shape: f32[5,36,1024], index: 0, kind: input, shape index: {}]   ;;  %s4358_s1 = inlined_call_operand.vmem [shape: f32[16,36], index: 1, kind: input, shape index: {}]   ;;  %s4359_s8 = inlined_call_operand.<no memory space> [shape: f32[1,1], index: 8, kind: input, shape index: {}]   ;;  %s4360_s2 = inlined_call_operand.vmem [shape: f32[16,1], index: 2, kind: input, shape index: {}]   ;;  %s4361_s4 = inlined_call_operand.vmem [shape: f32[32,1], index: 4, kind: input, shape index: {}]   ;;  %s4362_s6 = inlined_call_operand.vmem [shape: f32[64,1], index: 6, kind: input, shape index: {}]   ;;  %s4363_s3 = inlined_call_operand.vmem [shape: f32[32,48], index: 3, kind: input, shape index: {}]   ;;  %s4364_s5 = inlined_call_operand.vmem [shape: f32[64,128], index: 5, kind: input, shape index: {}]   ;;  %s4365_s7 = inlined_call_operand.vmem [shape: f32[1,64], index: 7, kind: input, shape index: {}]   ;;  %s4366_s9 = inlined_call_operand.vmem [shape: f32[1,128], index: 9, kind: output, shape index: {}]  }
   0x1   :  { %v69_v0 = vld [vmem:[%s4357_s0 + $0x108] sm:$0xf]  ;;  %v71_v1 = vld [vmem:[%s4357_s0 + $0x118] sm:$0xf]  ;;  %v68_v2 = vld [vmem:[%s4357_s0 + $0x100] sm:$0xf]  ;;  %172 = vmatprep.mubr.f32.mxu0 %v4367_v3  ;;  %249 = vmatprep.mubr.f32.mxu1 %v4367_v3 }
   0x2   :  { %2720 = vmatprep.subr.msk.mxu0 %vm83_vm0, %v69_v0  ;;  %2724 = vmatprep.subr.msk.mxu1 %vm83_vm0, %v71_v1  ;;  %v70_v4 = vld [vmem:[%s4357_s0 + $0x110] sm:$0xf]  ;;  %v61_v5 = vld [vmem:[%s4357_s0 + $0xc8] sm:$0xff]  ;;  %v63_v6 = vld [vmem:[%s4357_s0 + $0xd8] sm:$0xff]  ;;  %v14_v1 = vstv %s4359_s8  ;;  %vm3080_vm3 = vmmov 0   ;;  %vm2641_vm4 = vcmask 523264  }
   0x3   :  { %2721 = vmatpush1.msk.msra.mxu0 %vm83_vm0, %v68_v2  ;;  %2725 = vmatpush1.msk.msra.mxu1 %vm83_vm0, %v70_v4  ;;  %v60_v7 = vld [vmem:[%s4357_s0 + $0xc0] sm:$0xff]  ;;  %v62_v8 = vld [vmem:[%s4357_s0 + $0xd0] sm:$0xff]  ;;  %v53_v9 = vld [vmem:[%s4357_s0 + $0x88] sm:$0xff]  ;;  %15 = vst [vmem:[#allocation2] sm:$0x1] %v14_v1 }
   0x4   :  { %132 = vmatprep.subr.mxu0 %v61_v5  ;;  %209 = vmatprep.subr.mxu1 %v63_v6  ;;  %v55_v10 = vld [vmem:[%s4357_s0 + $0x98] sm:$0xff]  ;;  %v52_v11 = vld [vmem:[%s4357_s0 + $0x80] sm:$0xff]  ;;  %v54_v12 = vld [vmem:[%s4357_s0 + $0x90] sm:$0xff] }
   0x5   :  { %133 = vmatpush1.msra.mxu0 %v60_v7  ;;  %210 = vmatpush1.msra.mxu1 %v62_v8  ;;  %v45_v13 = vld [vmem:[%s4357_s0 + $0x48] sm:$0xff]  ;;  %v47_v14 = vld [vmem:[%s4357_s0 + $0x58] sm:$0xff]  ;;  %v44_v15 = vld [vmem:[%s4357_s0 + $0x40] sm:$0xff] }
   0x6   :  { %134 = vmatprep.subr.mxu0 %v53_v9  ;;  %211 = vmatprep.subr.mxu1 %v55_v10  ;;  %v46_v16 = vld [vmem:[%s4357_s0 + $0x50] sm:$0xff]  ;;  %v37_v17 = vld [vmem:[%s4357_s0 + $0x8] sm:$0xff]  ;;  %v39_v18 = vld [vmem:[%s4357_s0 + $0x18] sm:$0xff] }
   0x7   :  { %135 = vmatpush1.msra.mxu0 %v52_v11  ;;  %212 = vmatpush1.msra.mxu1 %v54_v12  ;;  %v36_v19 = vld [vmem:[%s4357_s0] sm:$0xff]  ;;  %v38_v20 = vld [vmem:[%s4357_s0 + $0x10] sm:$0xff]  ;;  %v73_v22 = vld [vmem:[%s4357_s0 + $0x128] sm:$0xf] }
   0x8   :  { %136 = vmatprep.subr.mxu0 %v45_v13  ;;  %213 = vmatprep.subr.mxu1 %v47_v14  ;;  %v3200_v21 = vld [vmem:[%s4358_s1] sm:$0xff]  ;;  %v75_v23 = vld [vmem:[%s4357_s0 + $0x138] sm:$0xf]  ;;  %v74_v25 = vld [vmem:[%s4357_s0 + $0x130] sm:$0xf] }
   0x9   :  { %137 = vmatpush1.msra.mxu0 %v44_v15  ;;  %214 = vmatpush1.msra.mxu1 %v46_v16  ;;  %v72_v24 = vld [vmem:[%s4357_s0 + $0x120] sm:$0xf]  ;;  %v65_v26 = vld [vmem:[%s4357_s0 + $0xe8] sm:$0xff]  ;;  %v67_v27 = vld [vmem:[%s4357_s0 + $0xf8] sm:$0xff] }
   0xa   :  { %138 = vmatprep.subr.mxu0 %v37_v17  ;;  %215 = vmatprep.subr.mxu1 %v39_v18  ;;  %v64_v28 = vld [vmem:[%s4357_s0 + $0xe0] sm:$0xff]  ;;  %v66_v29 = vld [vmem:[%s4357_s0 + $0xf0] sm:$0xff]  ;;  %v57_v30 = vld [vmem:[%s4357_s0 + $0xa8] sm:$0xff] }
   0xb   :  { %139 = vmatpush1.msra.mxu0 %v36_v19  ;;  %216 = vmatpush1.msra.mxu1 %v38_v20  ;;  %v59_v31 = vld [vmem:[%s4357_s0 + $0xb8] sm:$0xff]  ;;  %v3243_v32 = vld [vmem:[%s4358_s1 + $0x8] sm:$0xff]  ;;  %v56_v33 = vld [vmem:[%s4357_s0 + $0xa0] sm:$0xff] }
   0xc   :  { %2722 = vmatmul.mubr.msk.f32.vlgmr.msra.gmra.mxu0 %vm76_vm1, %v3200_v21  ;;  %2726 = vmatmul.mubr.msk.f32.vlgmr.msra.gmra.mxu1 %vm76_vm1, %v3200_v21  ;;  %v58_v34 = vld [vmem:[%s4357_s0 + $0xb0] sm:$0xff]  ;;  %v49_v35 = vld [vmem:[%s4357_s0 + $0x68] sm:$0xff]  ;;  %v51_v36 = vld [vmem:[%s4357_s0 + $0x78] sm:$0xff] }
   0xd   :  { %2728 = vmatprep.subr.msk.mxu0 %vm83_vm0, %v73_v22  ;;  %2732 = vmatprep.subr.msk.mxu1 %vm83_vm0, %v75_v23  ;;  %v48_v37 = vld [vmem:[%s4357_s0 + $0x60] sm:$0xff]  ;;  %v50_v38 = vld [vmem:[%s4357_s0 + $0x70] sm:$0xff]  ;;  %v41_v39 = vld [vmem:[%s4357_s0 + $0x28] sm:$0xff] }
   0xe   :  { %2729 = vmatpush1.msk.msra.mxu0 %vm83_vm0, %v72_v24  ;;  %2733 = vmatpush1.msk.msra.mxu1 %vm83_vm0, %v74_v25  ;;  %v43_v40 = vld [vmem:[%s4357_s0 + $0x38] sm:$0xff]  ;;  %v40_v41 = vld [vmem:[%s4357_s0 + $0x20] sm:$0xff]  ;;  %v42_v42 = vld [vmem:[%s4357_s0 + $0x30] sm:$0xff] }
   0xf   :  { %286 = vmatprep.subr.mxu0 %v65_v26  ;;  %363 = vmatprep.subr.mxu1 %v67_v27  ;;  %v2769_v43 = vld [vmem:[%s4357_s0 + $0x248] sm:$0xf]  ;;  %v2771_v44 = vld [vmem:[%s4357_s0 + $0x258] sm:$0xf]  ;;  %v2768_v45 = vld [vmem:[%s4357_s0 + $0x240] sm:$0xf] }
  0x10   :  { %287 = vmatpush1.msra.mxu0 %v64_v28  ;;  %364 = vmatpush1.msra.mxu1 %v66_v29  ;;  %v2770_v46 = vld [vmem:[%s4357_s0 + $0x250] sm:$0xf]  ;;  %v2761_v47 = vld [vmem:[%s4357_s0 + $0x208] sm:$0xff]  ;;  %v2763_v48 = vld [vmem:[%s4357_s0 + $0x218] sm:$0xff] }
  0x11   :  { %178 = vmatprep.mubr.f32.mxu0 %v4367_v3  ;;  %288 = vmatprep.subr.mxu0 %v57_v30  ;;  %v2760_v49 = vld [vmem:[%s4357_s0 + $0x200] sm:$0xff]  ;;  %v2762_v50 = vld [vmem:[%s4357_s0 + $0x210] sm:$0xff]  ;;  %v2753_v51 = vld [vmem:[%s4357_s0 + $0x1c8] sm:$0xff] }
  0x12   :  { %365 = vmatprep.subr.mxu1 %v59_v31  ;;  %2723 = vmatmul.mubr.msk.f32.gmra.mxu0 %vm76_vm1, %v3243_v32  ;;  %v2755_v52 = vld [vmem:[%s4357_s0 + $0x1d8] sm:$0xff]  ;;  %v2752_v53 = vld [vmem:[%s4357_s0 + $0x1c0] sm:$0xff]  ;;  %v2754_v54 = vld [vmem:[%s4357_s0 + $0x1d0] sm:$0xff] }
  0x13   :  { %255 = vmatprep.mubr.f32.mxu1 %v4367_v3  ;;  %289 = vmatpush1.msra.mxu0 %v56_v33  ;;  %v2745_v55 = vld [vmem:[%s4357_s0 + $0x188] sm:$0xff]  ;;  %v2747_v56 = vld [vmem:[%s4357_s0 + $0x198] sm:$0xff]  ;;  %v2744_v57 = vld [vmem:[%s4357_s0 + $0x180] sm:$0xff] }
  0x14   :  { %366 = vmatpush1.msra.mxu1 %v58_v34  ;;  %290 = vmatprep.subr.mxu0 %v49_v35  ;;  %v2746_v58 = vld [vmem:[%s4357_s0 + $0x190] sm:$0xff]  ;;  %v2737_v59 = vld [vmem:[%s4357_s0 + $0x148] sm:$0xff]  ;;  %v2739_v60 = vld [vmem:[%s4357_s0 + $0x158] sm:$0xff] }
  0x15   :  { %2727 = vmatmul.mubr.msk.f32.gmra.mxu1 %vm76_vm1, %v3243_v32  ;;  %367 = vmatprep.subr.mxu1 %v51_v36  ;;  %v2736_v61 = vld [vmem:[%s4357_s0 + $0x140] sm:$0xff]  ;;  %v2738_v62 = vld [vmem:[%s4357_s0 + $0x150] sm:$0xff]  ;;  %v2773_v63 = vld [vmem:[%s4357_s0 + $0x268] sm:$0xf] }
  0x16   :  { %291 = vmatpush1.msra.mxu0 %v48_v37  ;;  %368 = vmatpush1.msra.mxu1 %v50_v38  ;;  %v2775_v0 = vld [vmem:[%s4357_s0 + $0x278] sm:$0xf]  ;;  %v2772_v2 = vld [vmem:[%s4357_s0 + $0x260] sm:$0xf]  ;;  %v2774_v4 = vld [vmem:[%s4357_s0 + $0x270] sm:$0xf] }
  0x17   :  { %292 = vmatprep.subr.mxu0 %v41_v39  ;;  %369 = vmatprep.subr.mxu1 %v43_v40  ;;  %v2765_v5 = vld [vmem:[%s4357_s0 + $0x228] sm:$0xff]  ;;  %v2767_v6 = vld [vmem:[%s4357_s0 + $0x238] sm:$0xff]  ;;  %v2764_v7 = vld [vmem:[%s4357_s0 + $0x220] sm:$0xff] }
  0x18   :  { %293 = vmatpush1.msra.mxu0 %v40_v41  ;;  %326 = vmatprep.mubr.f32.mxu0 %v4367_v3  ;;  %v2766_v8 = vld [vmem:[%s4357_s0 + $0x230] sm:$0xff]  ;;  %v2757_v9 = vld [vmem:[%s4357_s0 + $0x1e8] sm:$0xff]  ;;  %v2759_v10 = vld [vmem:[%s4357_s0 + $0x1f8] sm:$0xff] }
  0x19   :  { %370 = vmatpush1.msra.mxu1 %v42_v42  ;;  %403 = vmatprep.mubr.f32.mxu1 %v4367_v3  ;;  %v2756_v11 = vld [vmem:[%s4357_s0 + $0x1e0] sm:$0xff]  ;;  %v2758_v12 = vld [vmem:[%s4357_s0 + $0x1f0] sm:$0xff]  ;;  %v2749_v13 = vld [vmem:[%s4357_s0 + $0x1a8] sm:$0xff] }
  0x1a   :  { %2730 = vmatmul.mubr.msk.f32.vlgmr.msra.gmra.mxu0 %vm76_vm1, %v3200_v21  ;;  %2734 = vmatmul.mubr.msk.f32.vlgmr.msra.gmra.mxu1 %vm76_vm1, %v3200_v21  ;;  %v2751_v14 = vld [vmem:[%s4357_s0 + $0x1b8] sm:$0xff]  ;;  %v2748_v15 = vld [vmem:[%s4357_s0 + $0x1a0] sm:$0xff]  ;;  %v2750_v16 = vld [vmem:[%s4357_s0 + $0x1b0] sm:$0xff] }
  0x1b   :  { %2776 = vmatprep.subr.msk.mxu0 %vm83_vm0, %v2769_v43  ;;  %2780 = vmatprep.subr.msk.mxu1 %vm83_vm0, %v2771_v44  ;;  %v2741_v17 = vld [vmem:[%s4357_s0 + $0x168] sm:$0xff]  ;;  %v2743_v18 = vld [vmem:[%s4357_s0 + $0x178] sm:$0xff]  ;;  %v2740_v19 = vld [vmem:[%s4357_s0 + $0x160] sm:$0xff] }
  0x1c   :  { %2777 = vmatpush1.msk.msra.mxu0 %vm83_vm0, %v2768_v45  ;;  %2781 = vmatpush1.msk.msra.mxu1 %vm83_vm0, %v2770_v46  ;;  %v2742_v20 = vld [vmem:[%s4357_s0 + $0x170] sm:$0xff]  ;;  %v2825_v22 = vld [vmem:[%s4357_s0 + $0x388] sm:$0xf]  ;;  %v2827_v23 = vld [vmem:[%s4357_s0 + $0x398] sm:$0xf] }
  0x1d   :  { %505 = vmatprep.subr.mxu0 %v2761_v47  ;;  %582 = vmatprep.subr.mxu1 %v2763_v48  ;;  %v2824_v24 = vld [vmem:[%s4357_s0 + $0x380] sm:$0xf]  ;;  %v2826_v25 = vld [vmem:[%s4357_s0 + $0x390] sm:$0xf]  ;;  %v2817_v26 = vld [vmem:[%s4357_s0 + $0x348] sm:$0xff] }
  0x1e   :  { %506 = vmatpush1.msra.mxu0 %v2760_v49  ;;  %583 = vmatpush1.msra.mxu1 %v2762_v50  ;;  %v2819_v27 = vld [vmem:[%s4357_s0 + $0x358] sm:$0xff]  ;;  %v2816_v28 = vld [vmem:[%s4357_s0 + $0x340] sm:$0xff]  ;;  %v2818_v29 = vld [vmem:[%s4357_s0 + $0x350] sm:$0xff] }
  0x1f   :  { %332 = vmatprep.mubr.f32.mxu0 %v4367_v3  ;;  %507 = vmatprep.subr.mxu0 %v2753_v51  ;;  %v2809_v30 = vld [vmem:[%s4357_s0 + $0x308] sm:$0xff]  ;;  %v2811_v31 = vld [vmem:[%s4357_s0 + $0x318] sm:$0xff]  ;;  %v2808_v33 = vld [vmem:[%s4357_s0 + $0x300] sm:$0xff] }
  0x20   :  { %584 = vmatprep.subr.mxu1 %v2755_v52  ;;  %2731 = vmatmul.mubr.msk.f32.gmra.mxu0 %vm76_vm1, %v3243_v32  ;;  %v2810_v34 = vld [vmem:[%s4357_s0 + $0x310] sm:$0xff]  ;;  %v2801_v35 = vld [vmem:[%s4357_s0 + $0x2c8] sm:$0xff]  ;;  %v2803_v36 = vld [vmem:[%s4357_s0 + $0x2d8] sm:$0xff] }
  0x21   :  { %409 = vmatprep.mubr.f32.mxu1 %v4367_v3  ;;  %508 = vmatpush1.msra.mxu0 %v2752_v53  ;;  %v2800_v37 = vld [vmem:[%s4357_s0 + $0x2c0] sm:$0xff]  ;;  %v2802_v38 = vld [vmem:[%s4357_s0 + $0x2d0] sm:$0xff]  ;;  %v2793_v39 = vld [vmem:[%s4357_s0 + $0x288] sm:$0xff] }
  0x22   :  { %585 = vmatpush1.msra.mxu1 %v2754_v54  ;;  %509 = vmatprep.subr.mxu0 %v2745_v55  ;;  %v2795_v40 = vld [vmem:[%s4357_s0 + $0x298] sm:$0xff]  ;;  %v2792_v41 = vld [vmem:[%s4357_s0 + $0x280] sm:$0xff]  ;;  %v2794_v42 = vld [vmem:[%s4357_s0 + $0x290] sm:$0xff] }
  0x23   :  { %2735 = vmatmul.mubr.msk.f32.gmra.mxu1 %vm76_vm1, %v3243_v32  ;;  %586 = vmatprep.subr.mxu1 %v2747_v56  ;;  %v2829_v43 = vld [vmem:[%s4357_s0 + $0x3a8] sm:$0xf]  ;;  %v2831_v44 = vld [vmem:[%s4357_s0 + $0x3b8] sm:$0xf]  ;;  %v2828_v45 = vld [vmem:[%s4357_s0 + $0x3a0] sm:$0xf] }
  0x24   :  { %510 = vmatpush1.msra.mxu0 %v2744_v57  ;;  %587 = vmatpush1.msra.mxu1 %v2746_v58  ;;  %v2830_v46 = vld [vmem:[%s4357_s0 + $0x3b0] sm:$0xf]  ;;  %v2821_v47 = vld [vmem:[%s4357_s0 + $0x368] sm:$0xff]  ;;  %v2823_v48 = vld [vmem:[%s4357_s0 + $0x378] sm:$0xff] }
  0x25   :  { %511 = vmatprep.subr.mxu0 %v2737_v59  ;;  %588 = vmatprep.subr.mxu1 %v2739_v60  ;;  %v2820_v49 = vld [vmem:[%s4357_s0 + $0x360] sm:$0xff]  ;;  %v2822_v50 = vld [vmem:[%s4357_s0 + $0x370] sm:$0xff]  ;;  %v2813_v51 = vld [vmem:[%s4357_s0 + $0x328] sm:$0xff] }
  0x26   :  { %512 = vmatpush1.msra.mxu0 %v2736_v61  ;;  %545 = vmatprep.mubr.f32.mxu0 %v4367_v3  ;;  %v2815_v52 = vld [vmem:[%s4357_s0 + $0x338] sm:$0xff]  ;;  %v2812_v53 = vld [vmem:[%s4357_s0 + $0x320] sm:$0xff]  ;;  %v2814_v54 = vld [vmem:[%s4357_s0 + $0x330] sm:$0xff] }
  0x27   :  { %589 = vmatpush1.msra.mxu1 %v2738_v62  ;;  %622 = vmatprep.mubr.f32.mxu1 %v4367_v3  ;;  %v2805_v55 = vld [vmem:[%s4357_s0 + $0x2e8] sm:$0xff]  ;;  %v2807_v56 = vld [vmem:[%s4357_s0 + $0x2f8] sm:$0xff]  ;;  %v2804_v57 = vld [vmem:[%s4357_s0 + $0x2e0] sm:$0xff] }
  0x28   :  { %2778 = vmatmul.mubr.msk.f32.vlgmr.msra.gmra.mxu0 %vm76_vm1, %v3200_v21  ;;  %2782 = vmatmul.mubr.msk.f32.vlgmr.msra.gmra.mxu1 %vm76_vm1, %v3200_v21  ;;  %v2806_v58 = vld [vmem:[%s4357_s0 + $0x2f0] sm:$0xff]  ;;  %v2797_v59 = vld [vmem:[%s4357_s0 + $0x2a8] sm:$0xff]  ;;  %v2799_v60 = vld [vmem:[%s4357_s0 + $0x2b8] sm:$0xff] }
  0x29   :  { %2784 = vmatprep.subr.msk.mxu0 %vm83_vm0, %v2773_v63  ;;  %2788 = vmatprep.subr.msk.mxu1 %vm83_vm0, %v2775_v0  ;;  %v2796_v61 = vld [vmem:[%s4357_s0 + $0x2a0] sm:$0xff]  ;;  %v2798_v62 = vld [vmem:[%s4357_s0 + $0x2b0] sm:$0xff]  ;;  %v2881_v63 = vld [vmem:[%s4357_s0 + $0x4c8] sm:$0xf] }
  0x2a   :  { %2785 = vmatpush1.msk.msra.mxu0 %vm83_vm0, %v2772_v2  ;;  %2789 = vmatpush1.msk.msra.mxu1 %vm83_vm0, %v2774_v4  ;;  %v2883_v0 = vld [vmem:[%s4357_s0 + $0x4d8] sm:$0xf]  ;;  %v2880_v1 = vld [vmem:[%s4357_s0 + $0x4c0] sm:$0xf]  ;;  %v2882_v2 = vld [vmem:[%s4357_s0 + $0x4d0] sm:$0xf] }
  0x2b   :  { %659 = vmatprep.subr.mxu0 %v2765_v5  ;;  %736 = vmatprep.subr.mxu1 %v2767_v6  ;;  %v2873_v4 = vld [vmem:[%s4357_s0 + $0x488] sm:$0xff]  ;;  %v2875_v5 = vld [vmem:[%s4357_s0 + $0x498] sm:$0xff]  ;;  %v2872_v6 = vld [vmem:[%s4357_s0 + $0x480] sm:$0xff] }
  0x2c   :  { %551 = vmatprep.mubr.f32.mxu0 %v4367_v3  ;;  %628 = vmatprep.mubr.f32.mxu1 %v4367_v3 }
  0x2d   :  { %660 = vmatpush1.msra.mxu0 %v2764_v7  ;;  %737 = vmatpush1.msra.mxu1 %v2766_v8  ;;  %v2874_v7 = vld [vmem:[%s4357_s0 + $0x490] sm:$0xff]  ;;  %v2865_v8 = vld [vmem:[%s4357_s0 + $0x448] sm:$0xff] }
  0x2e   :  { %2779 = vmatmul.mubr.msk.f32.gmra.mxu0 %vm76_vm1, %v3243_v32  ;;  %2783 = vmatmul.mubr.msk.f32.gmra.mxu1 %vm76_vm1, %v3243_v32 }
  0x2f   :  { %661 = vmatprep.subr.mxu0 %v2757_v9  ;;  %738 = vmatprep.subr.mxu1 %v2759_v10  ;;  %v2867_v9 = vld [vmem:[%s4357_s0 + $0x458] sm:$0xff]  ;;  %v2864_v10 = vld [vmem:[%s4357_s0 + $0x440] sm:$0xff] }
  0x30   :  { %662 = vmatpush1.msra.mxu0 %v2756_v11  ;;  %739 = vmatpush1.msra.mxu1 %v2758_v12  ;;  %v2866_v11 = vld [vmem:[%s4357_s0 + $0x450] sm:$0xff]  ;;  %v2857_v12 = vld [vmem:[%s4357_s0 + $0x408] sm:$0xff] }
  0x31   :  { %663 = vmatprep.subr.mxu0 %v2749_v13  ;;  %740 = vmatprep.subr.mxu1 %v2751_v14  ;;  %v2859_v13 = vld [vmem:[%s4357_s0 + $0x418] sm:$0xff]  ;;  %v2856_v14 = vld [vmem:[%s4357_s0 + $0x400] sm:$0xff] }
  0x32   :  { %664 = vmatpush1.msra.mxu0 %v2748_v15  ;;  %741 = vmatpush1.msra.mxu1 %v2750_v16  ;;  %v2858_v15 = vld [vmem:[%s4357_s0 + $0x410] sm:$0xff]  ;;  %v2849_v16 = vld [vmem:[%s4357_s0 + $0x3c8] sm:$0xff] }
  0x33   :  { %665 = vmatprep.subr.mxu0 %v2741_v17  ;;  %742 = vmatprep.subr.mxu1 %v2743_v18  ;;  %v2851_v17 = vld [vmem:[%s4357_s0 + $0x3d8] sm:$0xff]  ;;  %v2848_v18 = vld [vmem:[%s4357_s0 + $0x3c0] sm:$0xff] }
  0x34   :  { %666 = vmatpush1.msra.mxu0 %v2740_v19  ;;  %699 = vmatprep.mubr.f32.mxu0 %v4367_v3  ;;  %v2850_v19 = vld [vmem:[%s4357_s0 + $0x3d0] sm:$0xff] }
  0x35   :  { %743 = vmatpush1.msra.mxu1 %v2742_v20  ;;  %776 = vmatprep.mubr.f32.mxu1 %v4367_v3  ;;  %v2885_v20 = vld [vmem:[%s4357_s0 + $0x4e8] sm:$0xf] }
  0x36   :  { %2786 = vmatmul.mubr.msk.f32.vlgmr.msra.gmra.mxu0 %vm76_vm1, %v3200_v21  ;;  %2790 = vmatmul.mubr.msk.f32.vlgmr.msra.gmra.mxu1 %vm76_vm1, %v3200_v21 }
  0x37   :  { %2832 = vmatprep.subr.msk.mxu0 %vm83_vm0, %v2825_v22  ;;  %2836 = vmatprep.subr.msk.mxu1 %vm83_vm0, %v2827_v23  ;;  %v2887_v22 = vld [vmem:[%s4357_s0 + $0x4f8] sm:$0xf]  ;;  %v2884_v23 = vld [vmem:[%s4357_s0 + $0x4e0] sm:$0xf] }
  0x38   :  { %2833 = vmatpush1.msk.msra.mxu0 %vm83_vm0, %v2824_v24  ;;  %2837 = vmatpush1.msk.msra.mxu1 %vm83_vm0, %v2826_v25  ;;  %v2886_v24 = vld [vmem:[%s4357_s0 + $0x4f0] sm:$0xf]  ;;  %v2877_v25 = vld [vmem:[%s4357_s0 + $0x4a8] sm:$0xff] }
  0x39   :  { %894 = vmatprep.subr.mxu0 %v2817_v26  ;;  %971 = vmatprep.subr.mxu1 %v2819_v27  ;;  %v2879_v26 = vld [vmem:[%s4357_s0 + $0x4b8] sm:$0xff]  ;;  %v2876_v27 = vld [vmem:[%s4357_s0 + $0x4a0] sm:$0xff] }
  0x3a   :  { %705 = vmatprep.mubr.f32.mxu0 %v4367_v3  ;;  %782 = vmatprep.mubr.f32.mxu1 %v4367_v3 }
  0x3b   :  { %895 = vmatpush1.msra.mxu0 %v2816_v28  ;;  %972 = vmatpush1.msra.mxu1 %v2818_v29  ;;  %v2878_v28 = vld [vmem:[%s4357_s0 + $0x4b0] sm:$0xff]  ;;  %v2869_v29 = vld [vmem:[%s4357_s0 + $0x468] sm:$0xff] }
  0x3c   :  { %2787 = vmatmul.mubr.msk.f32.gmra.mxu0 %vm76_vm1, %v3243_v32  ;;  %2791 = vmatmul.mubr.msk.f32.gmra.mxu1 %vm76_vm1, %v3243_v32 }
  0x3d   :  { %896 = vmatprep.subr.mxu0 %v2809_v30  ;;  %973 = vmatprep.subr.mxu1 %v2811_v31  ;;  %v2871_v30 = vld [vmem:[%s4357_s0 + $0x478] sm:$0xff]  ;;  %v2868_v31 = vld [vmem:[%s4357_s0 + $0x460] sm:$0xff] }
  0x3e   :  { %897 = vmatpush1.msra.mxu0 %v2808_v33  ;;  %974 = vmatpush1.msra.mxu1 %v2810_v34  ;;  %v2870_v33 = vld [vmem:[%s4357_s0 + $0x470] sm:$0xff]  ;;  %v2861_v34 = vld [vmem:[%s4357_s0 + $0x428] sm:$0xff] }
  0x3f   :  { %898 = vmatprep.subr.mxu0 %v2801_v35  ;;  %975 = vmatprep.subr.mxu1 %v2803_v36  ;;  %v2863_v35 = vld [vmem:[%s4357_s0 + $0x438] sm:$0xff]  ;;  %v2860_v36 = vld [vmem:[%s4357_s0 + $0x420] sm:$0xff] }
  0x40   :  { %899 = vmatpush1.msra.mxu0 %v2800_v37  ;;  %976 = vmatpush1.msra.mxu1 %v2802_v38  ;;  %v2862_v37 = vld [vmem:[%s4357_s0 + $0x430] sm:$0xff]  ;;  %v2853_v38 = vld [vmem:[%s4357_s0 + $0x3e8] sm:$0xff] }
  0x41   :  { %900 = vmatprep.subr.mxu0 %v2793_v39  ;;  %977 = vmatprep.subr.mxu1 %v2795_v40  ;;  %v2855_v39 = vld [vmem:[%s4357_s0 + $0x3f8] sm:$0xff]  ;;  %v2852_v40 = vld [vmem:[%s4357_s0 + $0x3e0] sm:$0xff] }
  0x42   :  { %901 = vmatpush1.msra.mxu0 %v2792_v41  ;;  %934 = vmatprep.mubr.f32.mxu0 %v4367_v3  ;;  %v2854_v41 = vld [vmem:[%s4357_s0 + $0x3f0] sm:$0xff] }
  0x43   :  { %978 = vmatpush1.msra.mxu1 %v2794_v42  ;;  %1011 = vmatprep.mubr.f32.mxu1 %v4367_v3  ;;  %v2937_v42 = vld [vmem:[%s4357_s0 + $0x608] sm:$0xf] }
  0x44   :  { %2834 = vmatmul.mubr.msk.f32.vlgmr.msra.gmra.mxu0 %vm76_vm1, %v3200_v21  ;;  %2838 = vmatmul.mubr.msk.f32.vlgmr.msra.gmra.mxu1 %vm76_vm1, %v3200_v21 }
  0x45   :  { %2840 = vmatprep.subr.msk.mxu0 %vm83_vm0, %v2829_v43  ;;  %2844 = vmatprep.subr.msk.mxu1 %vm83_vm0, %v2831_v44  ;;  %v2939_v43 = vld [vmem:[%s4357_s0 + $0x618] sm:$0xf]  ;;  %v2936_v44 = vld [vmem:[%s4357_s0 + $0x600] sm:$0xf] }
  0x46   :  { %2841 = vmatpush1.msk.msra.mxu0 %vm83_vm0, %v2828_v45  ;;  %2845 = vmatpush1.msk.msra.mxu1 %vm83_vm0, %v2830_v46  ;;  %v2938_v45 = vld [vmem:[%s4357_s0 + $0x610] sm:$0xf]  ;;  %v2929_v46 = vld [vmem:[%s4357_s0 + $0x5c8] sm:$0xff] }
  0x47   :  { %1048 = vmatprep.subr.mxu0 %v2821_v47  ;;  %1125 = vmatprep.subr.mxu1 %v2823_v48  ;;  %v2931_v47 = vld [vmem:[%s4357_s0 + $0x5d8] sm:$0xff]  ;;  %v2928_v48 = vld [vmem:[%s4357_s0 + $0x5c0] sm:$0xff] }
  0x48   :  { %940 = vmatprep.mubr.f32.mxu0 %v4367_v3  ;;  %1017 = vmatprep.mubr.f32.mxu1 %v4367_v3 }
  0x49   :  { %1049 = vmatpush1.msra.mxu0 %v2820_v49  ;;  %1126 = vmatpush1.msra.mxu1 %v2822_v50  ;;  %v2930_v49 = vld [vmem:[%s4357_s0 + $0x5d0] sm:$0xff]  ;;  %v2921_v50 = vld [vmem:[%s4357_s0 + $0x588] sm:$0xff] }
  0x4a   :  { %2835 = vmatmul.mubr.msk.f32.gmra.mxu0 %vm76_vm1, %v3243_v32  ;;  %2839 = vmatmul.mubr.msk.f32.gmra.mxu1 %vm76_vm1, %v3243_v32 }
  0x4b   :  { %1050 = vmatprep.subr.mxu0 %v2813_v51  ;;  %1127 = vmatprep.subr.mxu1 %v2815_v52  ;;  %v2923_v51 = vld [vmem:[%s4357_s0 + $0x598] sm:$0xff]  ;;  %v2920_v52 = vld [vmem:[%s4357_s0 + $0x580] sm:$0xff] }
  0x4c   :  { %1051 = vmatpush1.msra.mxu0 %v2812_v53  ;;  %1128 = vmatpush1.msra.mxu1 %v2814_v54  ;;  %v2922_v53 = vld [vmem:[%s4357_s0 + $0x590] sm:$0xff]  ;;  %v2913_v54 = vld [vmem:[%s4357_s0 + $0x548] sm:$0xff] }
  0x4d   :  { %1052 = vmatprep.subr.mxu0 %v2805_v55  ;;  %1129 = vmatprep.subr.mxu1 %v2807_v56  ;;  %v2915_v55 = vld [vmem:[%s4357_s0 + $0x558] sm:$0xff]  ;;  %v2912_v56 = vld [vmem:[%s4357_s0 + $0x540] sm:$0xff] }
  0x4e   :  { %1053 = vmatpush1.msra.mxu0 %v2804_v57  ;;  %1130 = vmatpush1.msra.mxu1 %v2806_v58  ;;  %v2914_v57 = vld [vmem:[%s4357_s0 + $0x550] sm:$0xff]  ;;  %v2905_v58 = vld [vmem:[%s4357_s0 + $0x508] sm:$0xff] }
  0x4f   :  { %1054 = vmatprep.subr.mxu0 %v2797_v59  ;;  %1131 = vmatprep.subr.mxu1 %v2799_v60  ;;  %v2907_v59 = vld [vmem:[%s4357_s0 + $0x518] sm:$0xff]  ;;  %v2904_v60 = vld [vmem:[%s4357_s0 + $0x500] sm:$0xff] }
  0x50   :  { %1055 = vmatpush1.msra.mxu0 %v2796_v61  ;;  %1088 = vmatprep.mubr.f32.mxu0 %v4367_v3  ;;  %v2906_v61 = vld [vmem:[%s4357_s0 + $0x510] sm:$0xff] }
  0x51   :  { %1132 = vmatpush1.msra.mxu1 %v2798_v62  ;;  %1165 = vmatprep.mubr.f32.mxu1 %v4367_v3  ;;  %v2941_v62 = vld [vmem:[%s4357_s0 + $0x628] sm:$0xf] }
  0x52   :  { %2842 = vmatmul.mubr.msk.f32.vlgmr.msra.gmra.mxu0 %vm76_vm1, %v3200_v21  ;;  %2846 = vmatmul.mubr.msk.f32.vlgmr.msra.gmra.mxu1 %vm76_vm1, %v3200_v21 }
  0x53   :  { %2888 = vmatprep.subr.msk.mxu0 %vm83_vm0, %v2881_v63  ;;  %2892 = vmatprep.subr.msk.mxu1 %vm83_vm0, %v2883_v0  ;;  %v2943_v63 = vld [vmem:[%s4357_s0 + $0x638] sm:$0xf]  ;;  %v2940_v0 = vld [vmem:[%s4357_s0 + $0x620] sm:$0xf] }
  0x54   :  { %2889 = vmatpush1.msk.msra.mxu0 %vm83_vm0, %v2880_v1  ;;  %2893 = vmatpush1.msk.msra.mxu1 %vm83_vm0, %v2882_v2  ;;  %v2942_v1 = vld [vmem:[%s4357_s0 + $0x630] sm:$0xf]  ;;  %v2933_v2 = vld [vmem:[%s4357_s0 + $0x5e8] sm:$0xff] }
  0x55   :  { %1283 = vmatprep.subr.mxu0 %v2873_v4  ;;  %1360 = vmatprep.subr.mxu1 %v2875_v5  ;;  %v2935_v4 = vld [vmem:[%s4357_s0 + $0x5f8] sm:$0xff]  ;;  %v2932_v5 = vld [vmem:[%s4357_s0 + $0x5e0] sm:$0xff] }
  0x56   :  { %1094 = vmatprep.mubr.f32.mxu0 %v4367_v3  ;;  %1171 = vmatprep.mubr.f32.mxu1 %v4367_v3 }
  0x57   :  { %1284 = vmatpush1.msra.mxu0 %v2872_v6  ;;  %1361 = vmatpush1.msra.mxu1 %v2874_v7  ;;  %v2934_v6 = vld [vmem:[%s4357_s0 + $0x5f0] sm:$0xff]  ;;  %v2925_v7 = vld [vmem:[%s4357_s0 + $0x5a8] sm:$0xff] }
  0x58   :  { %2843 = vmatmul.mubr.msk.f32.gmra.mxu0 %vm76_vm1, %v3243_v32  ;;  %2847 = vmatmul.mubr.msk.f32.gmra.mxu1 %vm76_vm1, %v3243_v32 }
  0x59   :  { %1285 = vmatprep.subr.mxu0 %v2865_v8  ;;  %1362 = vmatprep.subr.mxu1 %v2867_v9  ;;  %v2927_v8 = vld [vmem:[%s4357_s0 + $0x5b8] sm:$0xff]  ;;  %v2924_v9 = vld [vmem:[%s4357_s0 + $0x5a0] sm:$0xff] }
  0x5a   :  { %1286 = vmatpush1.msra.mxu0 %v2864_v10  ;;  %1363 = vmatpush1.msra.mxu1 %v2866_v11  ;;  %v2926_v10 = vld [vmem:[%s4357_s0 + $0x5b0] sm:$0xff]  ;;  %v2917_v11 = vld [vmem:[%s4357_s0 + $0x568] sm:$0xff] }
  0x5b   :  { %1287 = vmatprep.subr.mxu0 %v2857_v12  ;;  %1364 = vmatprep.subr.mxu1 %v2859_v13  ;;  %v2919_v12 = vld [vmem:[%s4357_s0 + $0x578] sm:$0xff]  ;;  %v2916_v13 = vld [vmem:[%s4357_s0 + $0x560] sm:$0xff] }
  0x5c   :  { %1288 = vmatpush1.msra.mxu0 %v2856_v14  ;;  %1365 = vmatpush1.msra.mxu1 %v2858_v15  ;;  %v2918_v14 = vld [vmem:[%s4357_s0 + $0x570] sm:$0xff]  ;;  %v2909_v15 = vld [vmem:[%s4357_s0 + $0x528] sm:$0xff] }
  0x5d   :  { %1289 = vmatprep.subr.mxu0 %v2849_v16  ;;  %1366 = vmatprep.subr.mxu1 %v2851_v17  ;;  %v2911_v16 = vld [vmem:[%s4357_s0 + $0x538] sm:$0xff]  ;;  %v2908_v17 = vld [vmem:[%s4357_s0 + $0x520] sm:$0xff] }
  0x5e   :  { %1290 = vmatpush1.msra.mxu0 %v2848_v18  ;;  %1323 = vmatprep.mubr.f32.mxu0 %v4367_v3  ;;  %v2910_v18 = vld [vmem:[%s4357_s0 + $0x530] sm:$0xff] }
  0x5f   :  { %1367 = vmatpush1.msra.mxu1 %v2850_v19  ;;  %1400 = vmatprep.mubr.f32.mxu1 %v4367_v3  ;;  %v1973_v19 = vld [vmem:[%s4360_s2 + $0x8] sm:$0xff] }
  0x60   :  { %2890 = vmatmul.mubr.msk.f32.vlgmr.msra.gmra.mxu0 %vm76_vm1, %v3200_v21  ;;  %2894 = vmatmul.mubr.msk.f32.vlgmr.msra.gmra.mxu1 %vm76_vm1, %v3200_v21 }
  0x61   :  { %2896 = vmatprep.subr.msk.mxu0 %vm83_vm0, %v2885_v20  ;;  %2900 = vmatprep.subr.msk.mxu1 %vm83_vm0, %v2887_v22  ;;  %v3079_v20 = vmov 0   ;;  %v2021_v22 = vld [vmem:[%s4361_s4 + $0x8] sm:$0xff] }
  0x62   :  { %2897 = vmatpush1.msk.msra.mxu0 %vm83_vm0, %v2884_v23  ;;  %2901 = vmatpush1.msk.msra.mxu1 %vm83_vm0, %v2886_v24  ;;  %v2476_v23 = vld [vmem:[%s4362_s6 + $0x38] sm:$0xff] }
  0x63   :  { %1437 = vmatprep.subr.mxu0 %v2877_v25  ;;  %1514 = vmatprep.subr.mxu1 %v2879_v26  ;;  %v2472_v24 = vld [vmem:[%s4362_s6 + $0x18] sm:$0xff]  ;;  %v2470_v25 = vld [vmem:[%s4362_s6 + $0x8] sm:$0xff]  ;;  %v2631_v26 = vld [vmem:[#allocation2] sm:$0x1] }
  0x64   :  { %1329 = vmatprep.mubr.f32.mxu0 %v4367_v3  ;;  %1406 = vmatprep.mubr.f32.mxu1 %v4367_v3 }
  0x65   :  { %1438 = vmatpush1.msra.mxu0 %v2876_v27  ;;  %1515 = vmatpush1.msra.mxu1 %v2878_v28 }
  0x66   :  { %2891 = vmatmul.mubr.msk.f32.gmra.mxu0 %vm76_vm1, %v3243_v32  ;;  %2895 = vmatmul.mubr.msk.f32.gmra.mxu1 %vm76_vm1, %v3243_v32 }
  0x67   :  { %1439 = vmatprep.subr.mxu0 %v2869_v29  ;;  %1516 = vmatprep.subr.mxu1 %v2871_v30 }
  0x68   :  { %1440 = vmatpush1.msra.mxu0 %v2868_v31  ;;  %1517 = vmatpush1.msra.mxu1 %v2870_v33 }
  0x69   :  { %1441 = vmatprep.subr.mxu0 %v2861_v34  ;;  %1518 = vmatprep.subr.mxu1 %v2863_v35 }
  0x6a   :  { %1442 = vmatpush1.msra.mxu0 %v2860_v36  ;;  %1519 = vmatpush1.msra.mxu1 %v2862_v37 }
  0x6b   :  { %1443 = vmatprep.subr.mxu0 %v2853_v38  ;;  %1520 = vmatprep.subr.mxu1 %v2855_v39 }
  0x6c   :  { %1444 = vmatpush1.msra.mxu0 %v2852_v40  ;;  %1477 = vmatprep.mubr.f32.mxu0 %v4367_v3 }
  0x6d   :  { %1521 = vmatpush1.msra.mxu1 %v2854_v41  ;;  %1554 = vmatprep.mubr.f32.mxu1 %v4367_v3 }
  0x6e   :  { %2898 = vmatmul.mubr.msk.f32.vlgmr.msra.gmra.mxu0 %vm76_vm1, %v3200_v21  ;;  %2902 = vmatmul.mubr.msk.f32.vlgmr.msra.gmra.mxu1 %vm76_vm1, %v3200_v21 }
  0x6f   :  { %2944 = vmatprep.subr.msk.mxu0 %vm83_vm0, %v2937_v42  ;;  %2948 = vmatprep.subr.msk.mxu1 %vm83_vm0, %v2939_v43 }
  0x70   :  { %2945 = vmatpush1.msk.msra.mxu0 %vm83_vm0, %v2936_v44  ;;  %2949 = vmatpush1.msk.msra.mxu1 %vm83_vm0, %v2938_v45 }
  0x71   :  { %1672 = vmatprep.subr.mxu0 %v2929_v46  ;;  %1749 = vmatprep.subr.mxu1 %v2931_v47 }
  0x72   :  { %1483 = vmatprep.mubr.f32.mxu0 %v4367_v3  ;;  %1560 = vmatprep.mubr.f32.mxu1 %v4367_v3 }
  0x73   :  { %1673 = vmatpush1.msra.mxu0 %v2928_v48  ;;  %1750 = vmatpush1.msra.mxu1 %v2930_v49 }
  0x74   :  { %2899 = vmatmul.mubr.msk.f32.gmra.mxu0 %vm76_vm1, %v3243_v32  ;;  %2903 = vmatmul.mubr.msk.f32.gmra.mxu1 %vm76_vm1, %v3243_v32 }
  0x75   :  { %1674 = vmatprep.subr.mxu0 %v2921_v50  ;;  %1751 = vmatprep.subr.mxu1 %v2923_v51 }
  0x76   :  { %1675 = vmatpush1.msra.mxu0 %v2920_v52  ;;  %1752 = vmatpush1.msra.mxu1 %v2922_v53 }
  0x77   :  { %1676 = vmatprep.subr.mxu0 %v2913_v54  ;;  %1753 = vmatprep.subr.mxu1 %v2915_v55 }
  0x78   :  { %1677 = vmatpush1.msra.mxu0 %v2912_v56  ;;  %1754 = vmatpush1.msra.mxu1 %v2914_v57 }
  0x79   :  { %1678 = vmatprep.subr.mxu0 %v2905_v58  ;;  %1755 = vmatprep.subr.mxu1 %v2907_v59 }
  0x7a   :  { %1679 = vmatpush1.msra.mxu0 %v2904_v60  ;;  %1712 = vmatprep.mubr.f32.mxu0 %v4367_v3 }
  0x7b   :  { %1756 = vmatpush1.msra.mxu1 %v2906_v61  ;;  %1789 = vmatprep.mubr.f32.mxu1 %v4367_v3 }
  0x7c   :  { %2946 = vmatmul.mubr.msk.f32.vlgmr.msra.gmra.mxu0 %vm76_vm1, %v3200_v21  ;;  %2950 = vmatmul.mubr.msk.f32.vlgmr.msra.gmra.mxu1 %vm76_vm1, %v3200_v21 }
  0x7d   :  { %2952 = vmatprep.subr.msk.mxu0 %vm83_vm0, %v2941_v62  ;;  %2956 = vmatprep.subr.msk.mxu1 %vm83_vm0, %v2943_v63 }
  0x7e   :  { %2953 = vmatpush1.msk.msra.mxu0 %vm83_vm0, %v2940_v0  ;;  %2957 = vmatpush1.msk.msra.mxu1 %vm83_vm0, %v2942_v1  ;;  %v2023_v0 = vld [vmem:[%s4361_s4 + $0x18] sm:$0xff] }
  0x7f   :  { %1826 = vmatprep.subr.mxu0 %v2933_v2  ;;  %1903 = vmatprep.subr.mxu1 %v2935_v4  ;;  %v2022_v4 = vld [vmem:[%s4361_s4 + $0x10] sm:$0xff] }
  0x80   :  { %1718 = vmatprep.mubr.f32.mxu0 %v4367_v3  ;;  %1795 = vmatprep.mubr.f32.mxu1 %v4367_v3 }
  0x81   :  { %1827 = vmatpush1.msra.mxu0 %v2932_v5  ;;  %1904 = vmatpush1.msra.mxu1 %v2934_v6 }
  0x82   :  { %2947 = vmatmul.mubr.msk.f32.gmra.mxu0 %vm76_vm1, %v3243_v32  ;;  %2951 = vmatmul.mubr.msk.f32.gmra.mxu1 %vm76_vm1, %v3243_v32 }
  0x83   :  { %1828 = vmatprep.subr.mxu0 %v2925_v7  ;;  %1905 = vmatprep.subr.mxu1 %v2927_v8  ;;  %v2020_v7 = vld [vmem:[%s4361_s4] sm:$0xff] }
  0x84   :  { %1829 = vmatpush1.msra.mxu0 %v2924_v9  ;;  %1906 = vmatpush1.msra.mxu1 %v2926_v10  ;;  %v2475_v10 = vld [vmem:[%s4362_s6 + $0x30] sm:$0xff] }
  0x85   :  { %1830 = vmatprep.subr.mxu0 %v2917_v11  ;;  %1907 = vmatprep.subr.mxu1 %v2919_v12 }
  0x86   :  { %1831 = vmatpush1.msra.mxu0 %v2916_v13  ;;  %1908 = vmatpush1.msra.mxu1 %v2918_v14  ;;  %v2473_v13 = vld [vmem:[%s4362_s6 + $0x20] sm:$0xff] }
  0x87   :  { %1832 = vmatprep.subr.mxu0 %v2909_v15  ;;  %1909 = vmatprep.subr.mxu1 %v2911_v16  ;;  %v2471_v16 = vld [vmem:[%s4362_s6 + $0x10] sm:$0xff] }
  0x88   :  { %1833 = vmatpush1.msra.mxu0 %v2908_v17  ;;  %1866 = vmatprep.mubr.f32.mxu0 %v4367_v3 }
  0x89   :  { %1910 = vmatpush1.msra.mxu1 %v2910_v18  ;;  %1943 = vmatprep.mubr.f32.mxu1 %v4367_v3 }
  0x8a   :  { %2954 = vmatmul.mubr.msk.f32.vlgmr.msra.gmra.mxu0 %vm76_vm1, %v3200_v21  ;;  %2958 = vmatmul.mubr.msk.f32.vlgmr.msra.gmra.mxu1 %vm76_vm1, %v3200_v21  ;;  %v1972_v21 = vld [vmem:[%s4360_s2] sm:$0xff] }
  0x8b   :  { %1872 = vmatprep.mubr.f32.mxu0 %v4367_v3  ;;  %1949 = vmatprep.mubr.f32.mxu1 %v4367_v3 }
  0x8c   :  { %3076 = vset.pattern.permute.xlu0 %v3079_v20  ;;  %3077 = vset.pattern.permute.xlu1 %v3079_v20 }
  0x8d   :  { %1981 = vperm.xlu0 %3076, %v1973_v19   ;;  %2041 = vperm.xlu1 %3077, %v2023_v0   ;;  %v2469_v19 = vld [vmem:[%s4362_s6] sm:$0xff] }
  0x8e   :  { %2955 = vmatmul.mubr.msk.f32.gmra.mxu0 %vm76_vm1, %v3243_v32  ;;  %2959 = vmatmul.mubr.msk.f32.gmra.mxu1 %vm76_vm1, %v3243_v32  ;;  %v2474_v32 = vld [vmem:[%s4362_s6 + $0x28] sm:$0xff] }
  0x8f   :  { %2121 = vmatprep.mubr.f32.mxu1 %v4367_v3  ;;  %2299 = vmatprep.mubr.f32.mxu0 %v4367_v3 }
  0x91   :  { %1976 = vperm.xlu0 %3076, %v1972_v21   ;;  %2036 = vperm.xlu1 %3077, %v2022_v4  }
  0x95   :  { %2031 = vperm.xlu0 %3076, %v2021_v22   ;;  %2026 = vperm.xlu1 %3077, %v2020_v7  }
  0x99   :  { %2514 = vperm.xlu0 %3076, %v2476_v23   ;;  %2509 = vperm.xlu1 %3077, %v2475_v10  }
  0x9d   :  { %2504 = vperm.xlu0 %3076, %v2474_v32   ;;  %2499 = vperm.xlu1 %3077, %v2473_v13  }
  0xa1   :  { %2494 = vperm.xlu0 %3076, %v2472_v24   ;;  %2489 = vperm.xlu1 %3077, %v2471_v16  }
  0xa5   :  { %2484 = vperm.xlu0 %3076, %v2470_v25   ;;  %2479 = vperm.xlu1 %3077, %v2469_v19  }
  0xa9   :  { %2634 = vperm.xlu0 %3076, %v2631_v26  }
  0xcc   :  { %v3927_v27 = vpop.f32.mrf.mxu0  ;;  %v3931_v29 = vpop.f32.mrf.mxu1 }
  0xce   :  { %v3929_v28 = vpop.f32.mrf.mxu0  ;;  %v3935_v31 = vpop.f32.mrf.mxu1 }
  0xd2   :  { %v3933_v30 = vpop.f32.mrf.mxu0 }
  0xd4   :  { %v3939_v34 = vpop.f32.mrf.mxu0 }
  0xd5   :  { %v3937_v33 = vpop.f32.mrf.mxu1 }
  0xd7   :  { %v3941_v35 = vpop.f32.mrf.mxu1 }
  0xda   :  { %v3943_v36 = vpop.f32.mrf.mxu0  ;;  %v3947_v38 = vpop.f32.mrf.mxu1 }
  0xdc   :  { %v3945_v37 = vpop.f32.mrf.mxu0  ;;  %v3951_v40 = vpop.f32.mrf.mxu1 }
  0xdd   :  { %4373 = vst [vmem:[#allocation3_spill] sm:$0xff] %v3951_v40 }
  0xe0   :  { %v3949_v39 = vpop.f32.mrf.mxu0 }
  0xe2   :  { %v3955_v42 = vpop.f32.mrf.mxu0 }
  0xe3   :  { %v3953_v41 = vpop.f32.mrf.mxu1 }
  0xe5   :  { %v3957_v43 = vpop.f32.mrf.mxu1 }
  0xe6   :  { %4374 = vst [vmem:[#allocation4_spill] sm:$0xff] %v3957_v43 }
  0xe8   :  { %v3959_v44 = vpop.f32.mrf.mxu0  ;;  %v3961_v45 = vpop.f32.mrf.mxu1 }
  0xea   :  { %v3963_v46 = vpop.f32.mrf.mxu0  ;;  %v3965_v47 = vpop.f32.mrf.mxu1 }
  0xee   :  { %v3967_v48 = vpop.f32.mrf.mxu0  ;;  %v3969_v49 = vpop.f32.mrf.mxu1 }
  0xef   :  { %v799_v43 = vmax.f32 %v3937_v33, %v3969_v49 }
  0xf0   :  { %v3971_v50 = vpop.f32.mrf.mxu0  ;;  %v3973_v51 = vpop.f32.mrf.mxu1 }
  0xf6   :  { %v3975_v52 = vpop.f32.mrf.mxu0  ;;  %v3977_v53 = vpop.f32.mrf.mxu1 }
  0xf8   :  { %v3979_v54 = vpop.f32.mrf.mxu1  ;;  %v3983_v56 = vpop.f32.mrf.mxu0 }
  0xf9   :  { %4375 = vst [vmem:[#allocation5_spill] sm:$0xff] %v3979_v54  ;;  %v791_v54 = vmax.f32 %v3931_v29, %v3961_v45 }
  0xfc   :  { %v3985_v57 = vpop.f32.mrf.mxu1  ;;  %v3987_v58 = vpop.f32.mrf.mxu0 }
  0xfe   :  { %v3989_v59 = vpop.f32.mrf.mxu1  ;;  %v3993_v61 = vpop.f32.mrf.mxu0 }
  0xff   :  { %4376 = vst [vmem:[#allocation6_spill] sm:$0xff] %v3989_v59  ;;  %v790_v59 = vmax.f32 %v3929_v28, %v3963_v46  ;;  %v789_v28 = vmax.f32 %v3927_v27, %v3959_v44 }
 0x104   :  { %v3995_v62 = vpop.f32.mrf.mxu0  ;;  %v1013_v63 = vpop.f32.mrf.mxu1 }
 0x106   :  { %v938_v1 = vpop.f32.mrf.mxu0  ;;  %v4000_v2 = vpop.f32.mrf.mxu1 }
 0x108   :  { %v4070_v45 = vpop.permute.xlu0 %1981 }
 0x10a   :  { %v942_v5 = vpop.f32.mrf.mxu0  ;;  %v1019_v6 = vpop.f32.mrf.mxu1 }
 0x10b   :  { %v1188_v29 = vmax.f32 %v799_v43, %v1019_v6 }
 0x10c   :  { %v944_v8 = vpop.f32.mrf.mxu0  ;;  %v4008_v9 = vpop.f32.mrf.mxu1 }
 0x112   :  { %v4013_v11 = vpop.f32.mrf.mxu0  ;;  %v4015_v12 = vpop.f32.mrf.mxu1 }
 0x114   :  { %v4020_v14 = vpop.f32.mrf.mxu0  ;;  %v4022_v15 = vpop.f32.mrf.mxu1 }
 0x115   :  { %4377 = vst [vmem:[#allocation7_spill] sm:$0xff] %v4022_v15 }
 0x118   :  { %v4027_v17 = vpop.f32.mrf.mxu0  ;;  %v4029_v18 = vpop.f32.mrf.mxu1 }
 0x11a   :  { %v4034_v20 = vpop.f32.mrf.mxu0  ;;  %v4036_v21 = vpop.f32.mrf.mxu1 }
 0x11b   :  { %4378 = vst [vmem:[#allocation8_spill] sm:$0xff] %v4036_v21 }
 0x120   :  { %v1325_v22 = vpop.f32.mrf.mxu0  ;;  %v1402_v23 = vpop.f32.mrf.mxu1 }
 0x122   :  { %v1327_v32 = vpop.f32.mrf.mxu0  ;;  %v4038_v24 = vpop.f32.mrf.mxu1 }
 0x123   :  { %4379 = vst [vmem:[#allocation9_spill] sm:$0xff] %v4038_v24 }
 0x126   :  { %v1331_v25 = vpop.f32.mrf.mxu0  ;;  %v1408_v26 = vpop.f32.mrf.mxu1 }
 0x128   :  { %v1333_v0 = vpop.f32.mrf.mxu0  ;;  %v4040_v4 = vpop.f32.mrf.mxu1 }
 0x12e   :  { %v4042_v7 = vpop.f32.mrf.mxu0  ;;  %v4044_v10 = vpop.f32.mrf.mxu1 }
 0x12f   :  { %4380 = vst [vmem:[#allocation10_spill] sm:$0xff] %v4042_v7 }
 0x130   :  { %v4046_v13 = vpop.f32.mrf.mxu0  ;;  %v4048_v16 = vpop.f32.mrf.mxu1 }
 0x131   :  { %4381 = vst [vmem:[#allocation11_spill] sm:$0xff] %v4046_v13  ;;  %4382 = vst [vmem:[#allocation12_spill] sm:$0xff] %v4048_v16  ;;  %v1180_v16 = vmax.f32 %v791_v54, %v1013_v63  ;;  %v1577_v54 = vmax.f32 %v1188_v29, %v1408_v26  ;;  %v1178_v63 = vmax.f32 %v789_v28, %v3995_v62 }
 0x132   :  { %v793_v62 = vmax.f32 %v3943_v36, %v3975_v52  ;;  %v803_v36 = vmax.f32 %v3953_v41, %v3985_v57 }
 0x133   :  { %v1569_v46 = vmax.f32 %v1180_v16, %v1402_v23  ;;  %v795_v23 = vmax.f32 %v3947_v38, %v3977_v53 }
 0x134   :  { %v4050_v55 = vpop.f32.mrf.mxu0  ;;  %v4052_v19 = vpop.f32.mrf.mxu1  ;;  %v1182_v38 = vmax.f32 %v793_v62, %v4013_v11 }
 0x135   :  { %4383 = vst [vmem:[#allocation13_spill] sm:$0xff] %v4050_v55  ;;  %4384 = vst [vmem:[#allocation14_spill] sm:$0xff] %v4052_v19  ;;  %v1179_v19 = vmax.f32 %v790_v59, %v938_v1  ;;  %v1567_v59 = vmax.f32 %v1178_v63, %v1325_v22  ;;  %v4075_v1 = vpop.permute.xlu0 %1976 }
 0x136   :  { %v4054_v60 = vpop.f32.mrf.mxu0  ;;  %v4056_v3 = vpop.f32.mrf.mxu1 }
 0x137   :  { %4385 = vst [vmem:[#allocation15_spill] sm:$0xff] %v4054_v60  ;;  %4386 = vst [vmem:[#allocation16_spill] sm:$0xff] %v4056_v3  ;;  %v797_v60 = vmax.f32 %v3933_v30, %v3967_v48  ;;  %v798_v3 = vmax.f32 %v3939_v34, %v3971_v50  ;;  %v1568_v49 = vmax.f32 %v1179_v19, %v1327_v32 }
 0x139   :  { %v1186_v13 = vmax.f32 %v797_v60, %v942_v5  ;;  %v1187_v33 = vmax.f32 %v798_v3, %v944_v8  ;;  %v792_v3 = vmax.f32 %v3935_v31, %v3965_v47  ;;  %v800_v60 = vmax.f32 %v3941_v35, %v3973_v51 }
 0x13a   :  { %v794_v31 = vmax.f32 %v3945_v37, %v3983_v56  ;;  %v801_v35 = vmax.f32 %v3949_v39, %v3987_v58  ;;  %v1184_v39 = vmax.f32 %v795_v23, %v4015_v12 }
 0x13b   :  { %v1575_v48 = vmax.f32 %v1186_v13, %v1331_v25  ;;  %v1576_v24 = vmax.f32 %v1187_v33, %v1333_v0  ;;  %v1181_v51 = vmax.f32 %v792_v3, %v4000_v2  ;;  %v1189_v37 = vmax.f32 %v800_v60, %v4008_v9  ;;  %v4389_v25 = vld [vmem:[#allocation10_spill] sm:$0xff]  ;;  %v4390_v0 = vld [vmem:[#allocation11_spill] sm:$0xff] }
 0x13c   :  { %v1714_v40 = vpop.f32.mrf.mxu0  ;;  %v1791_v15 = vpop.f32.mrf.mxu1  ;;  %v1190_v57 = vmax.f32 %v801_v35, %v4027_v17  ;;  %v1192_v2 = vmax.f32 %v803_v36, %v4029_v18  ;;  %v1573_v12 = vmax.f32 %v1184_v39, %v4044_v10  ;;  %v1571_v26 = vmax.f32 %v1182_v38, %v4389_v25  ;;  %v4391_v18 = vld [vmem:[#allocation13_spill] sm:$0xff]  ;;  %v4392_v16 = vld [vmem:[#allocation14_spill] sm:$0xff]  ;;  %v4396_v38 = vld [vmem:[#allocation8_spill] sm:$0xff] }
 0x13d   :  { %v1956_v8 = vmax.f32 %v1567_v59, %v1714_v40  ;;  %v802_v40 = vmax.f32 %v3955_v42, %v3993_v61  ;;  %v1183_v42 = vmax.f32 %v794_v31, %v4020_v14  ;;  %v1578_v11 = vmax.f32 %v1189_v37, %v4040_v4  ;;  %v4388_v14 = vld [vmem:[#allocation9_spill] sm:$0xff]  ;;  %v4164_v37 = vld [vmem:[%s4363_s3 + $0x8] sm:$0xff] }
 0x13e   :  { %v1716_v21 = vpop.f32.mrf.mxu0  ;;  %v4064_v55 = vpop.f32.mrf.mxu1  ;;  %v1570_v17 = vmax.f32 %v1181_v51, %v4388_v14  ;;  %v1581_v4 = vmax.f32 %v1192_v2, %v4392_v16  ;;  %v4397_v39 = vld [vmem:[#allocation4_spill] sm:$0xff]  ;;  %v4400_v2 = vld [vmem:[#allocation7_spill] sm:$0xff] }
 0x13f   :  { %4387 = vst [vmem:[#allocation17_spill] sm:$0xff] %v4064_v55  ;;  %v1958_v55 = vmax.f32 %v1569_v46, %v1791_v15  ;;  %v1957_v34 = vmax.f32 %v1568_v49, %v1716_v21  ;;  %v1984_v58 = vadd.f32 %v4075_v1, %v1956_v8  ;;  %v1191_v9 = vmax.f32 %v802_v40, %v4034_v20  ;;  %v4393_v46 = vld [vmem:[#allocation15_spill] sm:$0xff]  ;;  %v4404_v14 = vld [vmem:[#allocation16_spill] sm:$0xff] }
 0x140   :  { %v1579_v20 = vmax.f32 %v1190_v57, %v4391_v18  ;;  %v4395_v8 = vmov 0.0   ;;  %v4405_v25 = vld [vmem:[#allocation12_spill] sm:$0xff] }
 0x141   :  { %v1986_v5 = vadd.f32 %v4075_v1, %v1958_v55  ;;  %v1985_v15 = vadd.f32 %v4075_v1, %v1957_v34  ;;  %v1580_v33 = vmax.f32 %v1191_v9, %v4393_v46  ;;  %v2000_v49 = vmax.f32 %v1984_v58, 0.0  ;;  %v2018_v58 = vld [vmem:[%s4363_s3 + $0x10] sm:$0xff]  ;;  %v4401_v9 = vld [vmem:[#allocation3_spill] sm:$0xff] }
 0x142   :  { %v1720_v7 = vpop.f32.mrf.mxu0  ;;  %v1797_v30 = vpop.f32.mrf.mxu1 }
 0x143   :  { %v1966_v50 = vmax.f32 %v1577_v54, %v1797_v30  ;;  %v1964_v6 = vmax.f32 %v1575_v48, %v1720_v7  ;;  %v4107_v53 = vmax.f32 %v1986_v5, 0.0  ;;  %v4112_v61 = vmax.f32 %v1985_v15, 0.0  ;;  %v4143_v15 = vld [vmem:[%s4363_s3] sm:$0xff] }
 0x144   :  { %v1722_v43 = vpop.f32.mrf.mxu0  ;;  %v1799_v47 = vpop.f32.mrf.mxu1  ;;  %v1572_v7 = vmax.f32 %v1183_v42, %v4390_v0 }
 0x145   :  { %v1994_v27 = vadd.f32 %v4070_v45, %v1966_v50  ;;  %v1965_v44 = vmax.f32 %v1576_v24, %v1722_v43  ;;  %v1992_v52 = vadd.f32 %v4070_v45, %v1964_v6  ;;  %v1967_v19 = vmax.f32 %v1578_v11, %v1799_v47  ;;  %v4402_v11 = vld [vmem:[#allocation5_spill] sm:$0xff] }
 0x146   :  { %v4394_v50 = vld [vmem:[#allocation17_spill] sm:$0xff] }
 0x147   :  { %v4086_v21 = vmax.f32 %v1994_v27, 0.0  ;;  %v1993_v22 = vadd.f32 %v4070_v45, %v1965_v44  ;;  %v2008_v13 = vmax.f32 %v1992_v52, 0.0  ;;  %v1959_v43 = vmax.f32 %v1570_v17, %v4394_v50 }
 0x148   :  { %v1995_v6 = vadd.f32 %v4070_v45, %v1967_v19 }
 0x149   :  { %v4101_v55 = vmax.f32 %v1993_v22, 0.0  ;;  %2077 = vmatprep.subr.mxu1 %v4086_v21  ;;  %v1987_v23 = vadd.f32 %v4075_v1, %v1959_v43 }
 0x14a   :  { %v1868_v41 = vpop.f32.mrf.mxu0  ;;  %v1945_v56 = vpop.f32.mrf.mxu1  ;;  %v2011_v36 = vmax.f32 %v1995_v6, 0.0 }
 0x14b   :  { %2078 = vmatpush1.msra.mxu1 %v4101_v55  ;;  %v1962_v10 = vmax.f32 %v1573_v12, %v1945_v56  ;;  %v1960_v54 = vmax.f32 %v1571_v26, %v1868_v41  ;;  %v2003_v52 = vmax.f32 %v1987_v23, 0.0  ;;  %v4398_v41 = vld [vmem:[#allocation6_spill] sm:$0xff]  ;;  %v4403_v12 = vmax.f32 %v4401_v9, %v4402_v11 }
 0x14c   :  { %v1870_v32 = vpop.f32.mrf.mxu0  ;;  %v4119_v24 = vpop.f32.mrf.mxu1  ;;  %2079 = vmatprep.subr.mxu1 %v4107_v53  ;;  %v4399_v56 = vmax.f32 %v4397_v39, %v4398_v41 }
 0x14d   :  { %2080 = vmatpush1.msra.mxu1 %v4112_v61  ;;  %v1961_v63 = vmax.f32 %v1572_v7, %v1870_v32  ;;  %v1990_v27 = vadd.f32 %v4075_v1, %v1962_v10  ;;  %v1988_v60 = vadd.f32 %v4075_v1, %v1960_v54  ;;  %v1185_v32 = vmax.f32 %v4403_v12, %v4400_v2 }
 0x14e   :  { %v1874_v29 = vpop.f32.mrf.mxu0  ;;  %v1951_v28 = vpop.f32.mrf.mxu1  ;;  %2081 = vmatprep.subr.mxu1 %v4101_v55  ;;  %v1193_v42 = vmax.f32 %v4399_v56, %v4396_v38 }
 0x14f   :  { %2082 = vmatpush1.msra.mxu1 %v2008_v13  ;;  %v1968_v30 = vmax.f32 %v1579_v20, %v1874_v29  ;;  %v1970_v48 = vmax.f32 %v1581_v4, %v1951_v28  ;;  %v1989_v62 = vadd.f32 %v4075_v1, %v1961_v63  ;;  %v4151_v47 = vmax.f32 %v1990_v27, 0.0  ;;  %v4249_v28 = vpop.permute.xlu0 %2031 }
 0x150   :  { %v1876_v34 = vpop.f32.mrf.mxu0  ;;  %2083 = vmatprep.subr.mxu1 %v4112_v61  ;;  %v2004_v40 = vmax.f32 %v1988_v60, 0.0  ;;  %v1953_v57 = vpop.f32.mrf.mxu1  ;;  %v1582_v17 = vmax.f32 %v1193_v42, %v4404_v14  ;;  %v1574_v26 = vmax.f32 %v1185_v32, %v4405_v25 }
 0x151   :  { %v1969_v59 = vmax.f32 %v1580_v33, %v1876_v34  ;;  %2084 = vmatpush1.msra.mxu1 %v2000_v49  ;;  %v1996_v44 = vadd.f32 %v4070_v45, %v1968_v30  ;;  %v1998_v3 = vadd.f32 %v4070_v45, %v1970_v48  ;;  %v4156_v51 = vmax.f32 %v1989_v62, 0.0 }
 0x152   :  { %2085 = vmatprep.subr.mxu1 %v2008_v13  ;;  %v1971_v0 = vmax.f32 %v1582_v17, %v1953_v57  ;;  %v1963_v7 = vmax.f32 %v1574_v26, %v4119_v24  ;;  %v2019_v13 = vld [vmem:[%s4363_s3 + $0x18] sm:$0xff] }
 0x153   :  { %v1997_v5 = vadd.f32 %v4070_v45, %v1969_v59  ;;  %2086 = vmatpush1.msra.mxu1 %v4395_v8  ;;  %v4145_v22 = vmax.f32 %v1998_v3, 0.0  ;;  %v2012_v31 = vmax.f32 %v1996_v44, 0.0 }
 0x154   :  { %2087 = vmatprep.subr.mxu1 %v2000_v49  ;;  %v1999_v18 = vadd.f32 %v4070_v45, %v1971_v0 }
 0x155   :  { %v4148_v35 = vmax.f32 %v1997_v5, 0.0  ;;  %2088 = vmatpush1.msra.mxu1 %v4395_v8  ;;  %2255 = vmatprep.subr.mxu0 %v4145_v22 }
 0x156   :  { %2960 = vmatmul.mubr.msk.f32.vlgmr.msra.gmra.mxu1 %vm2044_vm2, %v4143_v15  ;;  %2166 = vmatprep.subr.mxu1 %v2012_v31 }
 0x157   :  { %2256 = vmatpush1.msra.mxu0 %v4148_v35  ;;  %2167 = vmatpush1.msra.mxu1 %v2011_v36 }
 0x158   :  { %2257 = vmatprep.subr.mxu0 %v4151_v47  ;;  %2168 = vmatprep.subr.mxu1 %v2004_v40 }
 0x159   :  { %2258 = vmatpush1.msra.mxu0 %v4156_v51  ;;  %2127 = vmatprep.mubr.f32.mxu1 %v4395_v8 }
 0x15a   :  { %2259 = vmatprep.subr.mxu0 %v4148_v35  ;;  %2169 = vmatpush1.msra.mxu1 %v2003_v52 }
 0x15b   :  { %2260 = vmatpush1.msra.mxu0 %v2012_v31  ;;  %2961 = vmatmul.mubr.msk.f32.gmra.mxu1 %vm2044_vm2, %v4164_v37 }
 0x15c   :  { %2170 = vmatprep.subr.mxu1 %v2011_v36  ;;  %2261 = vmatprep.subr.mxu0 %v4156_v51 }
 0x15d   :  { %2171 = vmatpush1.msra.mxu1 %v4086_v21  ;;  %2262 = vmatpush1.msra.mxu0 %v2004_v40 }
 0x15e   :  { %2172 = vmatprep.subr.mxu1 %v2003_v52  ;;  %2263 = vmatprep.subr.mxu0 %v2012_v31 }
 0x15f   :  { %2133 = vmatprep.mubr.f32.mxu1 %v4395_v8  ;;  %2173 = vmatpush1.msra.mxu1 %v4107_v53 }
 0x160   :  { %2264 = vmatpush1.msra.mxu0 %v2011_v36  ;;  %2962 = vmatmul.mubr.msk.f32.gmra.mxu1 %vm2044_vm2, %v2018_v58 }
 0x161   :  { %2174 = vmatprep.subr.mxu1 %v4086_v21  ;;  %2265 = vmatprep.subr.mxu0 %v2004_v40  ;;  %v1991_v21 = vadd.f32 %v4075_v1, %v1963_v7  ;;  %v2461_v1 = vld [vmem:[%s4364_s5] sm:$0xff] }
 0x162   :  { %2175 = vmatpush1.msra.mxu1 %v4101_v55  ;;  %2266 = vmatpush1.msra.mxu0 %v2003_v52  ;;  %v2015_v55 = vmax.f32 %v1999_v18, 0.0 }
 0x163   :  { %2176 = vmatprep.subr.mxu1 %v4107_v53  ;;  %2968 = vmatmul.mubr.msk.f32.vlgmr.msra.gmra.mxu0 %vm2044_vm2, %v4143_v15  ;;  %v2007_v45 = vmax.f32 %v1991_v21, 0.0  ;;  %v4241_v53 = vpop.permute.xlu1 %2041 }
 0x164   :  { %2139 = vmatprep.mubr.f32.mxu1 %v4395_v8  ;;  %2177 = vmatpush1.msra.mxu1 %v4112_v61 }
 0x165   :  { %2305 = vmatprep.mubr.f32.mxu0 %v4395_v8  ;;  %2963 = vmatmul.mubr.msk.f32.gmra.mxu1 %vm2044_vm2, %v2019_v13 }
 0x166   :  { %2344 = vmatprep.subr.mxu1 %v4395_v8  ;;  %2210 = vmatprep.mubr.f32.mxu1 %v4395_v8 }
 0x167   :  { %2969 = vmatmul.mubr.msk.f32.gmra.mxu0 %vm2044_vm2, %v4164_v37  ;;  %v4243_v61 = vpop.permute.xlu1 %2036 }
 0x168   :  { %2311 = vmatprep.mubr.f32.mxu0 %v4395_v8 }
 0x169   :  { %2964 = vmatmul.mubr.msk.f32.vlgmr.msra.gmra.mxu1 %vm2044_vm2, %v4143_v15 }
 0x16a   :  { %2345 = vmatpush1.msra.mxu1 %v2015_v55  ;;  %2216 = vmatprep.mubr.f32.mxu1 %v4395_v8 }
 0x16b   :  { %2346 = vmatprep.subr.mxu1 %v4395_v8  ;;  %2970 = vmatmul.mubr.msk.f32.gmra.mxu0 %vm2044_vm2, %v2018_v58  ;;  %v4245_v24 = vpop.permute.xlu1 %2026 }
 0x16c   :  { %2347 = vmatpush1.msra.mxu1 %v2007_v45  ;;  %2317 = vmatprep.mubr.f32.mxu0 %v4395_v8 }
 0x16d   :  { %2348 = vmatprep.subr.mxu1 %v2015_v55  ;;  %2965 = vmatmul.mubr.msk.f32.gmra.mxu1 %vm2044_vm2, %v4164_v37 }
 0x16e   :  { %2349 = vmatpush1.msra.mxu1 %v4145_v22  ;;  %2222 = vmatprep.mubr.f32.mxu1 %v4395_v8 }
 0x16f   :  { %2350 = vmatprep.subr.mxu1 %v2007_v45  ;;  %2971 = vmatmul.mubr.msk.f32.gmra.mxu0 %vm2044_vm2, %v2019_v13 }
 0x170   :  { %2351 = vmatpush1.msra.mxu1 %v4151_v47  ;;  %3042 = vmatprep.mubr.f32.mxu0 %v2461_v1 }
 0x171   :  { %2352 = vmatprep.subr.mxu1 %v4145_v22  ;;  %2966 = vmatmul.mubr.msk.f32.gmra.mxu1 %vm2044_vm2, %v2018_v58 }
 0x172   :  { %2353 = vmatpush1.msra.mxu1 %v4148_v35  ;;  %2228 = vmatprep.mubr.f32.mxu1 %v4395_v8 }
 0x173   :  { %2354 = vmatprep.subr.mxu1 %v4151_v47 }
 0x174   :  { %2355 = vmatpush1.msra.mxu1 %v4156_v51 }
 0x175   :  { %2967 = vmatmul.mubr.msk.f32.gmra.mxu1 %vm2044_vm2, %v2019_v13  ;;  %3054 = vmatprep.subr.mxu1 %v4395_v8 }
 0x176   :  { %2388 = vmatprep.mubr.f32.mxu1 %v4395_v8 }
 0x179   :  { %2972 = vmatmul.mubr.msk.f32.vlgmr.msra.gmra.mxu1 %vm2044_vm2, %v4143_v15 }
 0x17a   :  { %2394 = vmatprep.mubr.f32.mxu1 %v4395_v8 }
 0x17d   :  { %2973 = vmatmul.mubr.msk.f32.gmra.mxu1 %vm2044_vm2, %v4164_v37 }
 0x17e   :  { %2400 = vmatprep.mubr.f32.mxu1 %v4395_v8 }
 0x181   :  { %2974 = vmatmul.mubr.msk.f32.gmra.mxu1 %vm2044_vm2, %v2018_v58 }
 0x182   :  { %2406 = vmatprep.mubr.f32.mxu1 %v4395_v8 }
 0x185   :  { %2975 = vmatmul.mubr.msk.f32.gmra.mxu1 %vm2044_vm2, %v2019_v13 }
 0x186   :  { %3070 = vmatprep.mubr.msk.f32.mxu1 %vm3080_vm3, %v4395_v8 }
 0x216   :  { %v2123_v20 = vpop.f32.mrf.mxu1 }
 0x217   :  { %v2124_v16 = vadd.f32 %v2123_v20, %v4245_v24 }
 0x218   :  { %v2125_v4 = vpop.f32.mrf.mxu1 }
 0x219   :  { %v2126_v19 = vadd.f32 %v2125_v4, %v4245_v24  ;;  %v2413_v10 = vmax.f32 %v2124_v16, 0.0 }
 0x21b   :  { %v2414_v29 = vmax.f32 %v2126_v19, 0.0  ;;  %v2129_v46 = vpop.f32.mrf.mxu1 }
 0x21c   :  { %v2130_v49 = vadd.f32 %v2129_v46, %v4249_v28 }
 0x21d   :  { %v4251_v33 = vmax.f32 %v2413_v10, %v2414_v29  ;;  %v2131_v54 = vpop.f32.mrf.mxu1 }
 0x21e   :  { %v2132_v63 = vadd.f32 %v2131_v54, %v4249_v28  ;;  %v2421_v30 = vmax.f32 %v2130_v49, 0.0 }
 0x220   :  { %v2422_v48 = vmax.f32 %v2132_v63, 0.0  ;;  %v4255_v34 = vpop.f32.mrf.mxu1 }
 0x222   :  { %v4257_v50 = vmax.f32 %v2421_v30, %v2422_v48  ;;  %v4259_v43 = vpop.f32.mrf.mxu1 }
 0x223   :  { %v2301_v60 = vpop.f32.mrf.mxu0 }
 0x224   :  { %v2302_v63 = vadd.f32 %v2301_v60, %v4245_v24 }
 0x225   :  { %v4261_v59 = vpop.f32.mrf.mxu1  ;;  %v2303_v15 = vpop.f32.mrf.mxu0 }
 0x226   :  { %v2304_v30 = vadd.f32 %v2303_v15, %v4245_v24 }
 0x227   :  { %v4263_v6 = vpop.f32.mrf.mxu1  ;;  %v2307_v31 = vpop.f32.mrf.mxu0 }
 0x228   :  { %v2308_v48 = vadd.f32 %v2307_v31, %v4249_v28 }
 0x229   :  { %v4265_v27 = vpop.f32.mrf.mxu1  ;;  %v2309_v47 = vpop.f32.mrf.mxu0 }
 0x22a   :  { %v2310_v10 = vadd.f32 %v2309_v47, %v4249_v28 }
 0x22b   :  { %v4267_v44 = vpop.f32.mrf.mxu1  ;;  %v2313_v51 = vpop.f32.mrf.mxu0 }
 0x22c   :  { %v2314_v1 = vadd.f32 %v2313_v51, %v4243_v61 }
 0x22d   :  { %v4269_v3 = vpop.f32.mrf.mxu1  ;;  %v2315_v38 = vpop.f32.mrf.mxu0 }
 0x22e   :  { %v2316_v4 = vadd.f32 %v2315_v38, %v4243_v61  ;;  %v2417_v38 = vmax.f32 %v2302_v63, 0.0 }
 0x22f   :  { %v4271_v62 = vpop.f32.mrf.mxu1  ;;  %v2319_v56 = vpop.f32.mrf.mxu0 }
 0x230   :  { %v2320_v7 = vadd.f32 %v2319_v56, %v4241_v53  ;;  %v2434_v51 = vmax.f32 %v2316_v4, 0.0 }
 0x231   :  { %v4273_v5 = vpop.f32.mrf.mxu1  ;;  %v2321_v12 = vpop.f32.mrf.mxu0 }
 0x232   :  { %v2322_v13 = vadd.f32 %v2321_v12, %v4241_v53  ;;  %v2441_v49 = vmax.f32 %v2320_v7, 0.0 }
 0x233   :  { %v4275_v22 = vpop.f32.mrf.mxu1 }
 0x234   :  { %v2442_v54 = vmax.f32 %v2322_v13, 0.0  ;;  %v2227_v60 = vadd.f32 %v4275_v22, %v4243_v61  ;;  %v2215_v22 = vadd.f32 %v4267_v44, %v4245_v24  ;;  %v2138_v44 = vadd.f32 %v4259_v43, %v4243_v61  ;;  %v2464_v13 = vld [vmem:[%s4364_s5 + $0x18] sm:$0xff] }
 0x235   :  { %v4277_v23 = vpop.f32.mrf.mxu1 }
 0x236   :  { %v2231_v15 = vadd.f32 %v4277_v23, %v4241_v53  ;;  %v2219_v23 = vadd.f32 %v4269_v3, %v4249_v28  ;;  %v2416_v3 = vmax.f32 %v2215_v22, 0.0  ;;  %v2630_v22 = vld [vmem:[%s4365_s7] sm:$0x1] }
 0x237   :  { %v2232_v35 = vpop.f32.mrf.mxu1 }
 0x238   :  { %v2233_v47 = vadd.f32 %v2232_v35, %v4241_v53  ;;  %v2225_v35 = vadd.f32 %v4273_v5, %v4243_v61 }
 0x239   :  { %v2390_v36 = vpop.f32.mrf.mxu1 }
 0x23a   :  { %v2391_v18 = vadd.f32 %v2390_v36, %v4245_v24  ;;  %v2431_v12 = vmax.f32 %v2225_v35, 0.0 }
 0x23b   :  { %v2392_v40 = vpop.f32.mrf.mxu1 }
 0x23c   :  { %v2393_v14 = vadd.f32 %v2392_v40, %v4245_v24  ;;  %v2419_v29 = vmax.f32 %v2391_v18, 0.0  ;;  %v2433_v40 = vmax.f32 %v2314_v1, 0.0  ;;  %v2466_v18 = vld [vmem:[%s4364_s5 + $0x28] sm:$0xff]  ;;  %v2515_v1 = vpop.permute.xlu0 %2514 }
 0x23d   :  { %v2396_v52 = vpop.f32.mrf.mxu1 }
 0x23e   :  { %v2397_v17 = vadd.f32 %v2396_v52, %v4249_v28  ;;  %v2420_v20 = vmax.f32 %v2393_v14, 0.0  ;;  %v2426_v52 = vmax.f32 %v2310_v10, 0.0  ;;  %v2455_v31 = vmax.f32 %v2433_v40, %v2434_v51 }
 0x23f   :  { %v2398_v37 = vpop.f32.mrf.mxu1  ;;  %v2423_v14 = vmax.f32 %v2219_v23, 0.0  ;;  %v2637_v23 = vlaneseq }
 0x240   :  { %v2399_v9 = vadd.f32 %v2398_v37, %v4249_v28  ;;  %v2427_v16 = vmax.f32 %v2397_v17, 0.0  ;;  %v2457_v36 = vmax.f32 %v2419_v29, %v2420_v20  ;;  %v2456_v37 = vmax.f32 %v2441_v49, %v2442_v54  ;;  %v2505_v10 = vpop.permute.xlu0 %2504 }
 0x241   :  { %v2402_v39 = vpop.f32.mrf.mxu1 }
 0x242   :  { %v2403_v11 = vadd.f32 %v2402_v39, %v4243_v61  ;;  %v2428_v21 = vmax.f32 %v2399_v9, 0.0  ;;  %v2418_v39 = vmax.f32 %v2304_v30, 0.0  ;;  %v2439_v9 = vmax.f32 %v2231_v15, 0.0 }
 0x243   :  { %v2404_v41 = vpop.f32.mrf.mxu1 }
 0x244   :  { %v2405_v57 = vadd.f32 %v2404_v41, %v4243_v61  ;;  %v2435_v55 = vmax.f32 %v2403_v11, 0.0  ;;  %v2458_v46 = vmax.f32 %v2427_v16, %v2428_v21  ;;  %v2425_v41 = vmax.f32 %v2308_v48, 0.0  ;;  %v2468_v21 = vld [vmem:[%s4364_s5 + $0x38] sm:$0xff]  ;;  %v2510_v16 = vpop.permute.xlu1 %2509  ;;  %v2495_v40 = vpop.permute.xlu0 %2494 }
 0x245   :  { %v2408_v42 = vpop.f32.mrf.mxu1  ;;  %v2144_v11 = vadd.f32 %v4263_v6, %v4241_v53  ;;  %v2136_v6 = vadd.f32 %v4255_v34, %v4243_v61  ;;  %v2462_v61 = vld [vmem:[%s4364_s5 + $0x8] sm:$0xff]  ;;  %v2463_v34 = vld [vmem:[%s4364_s5 + $0x10] sm:$0xff] }
 0x246   :  { %v2409_v58 = vadd.f32 %v2408_v42, %v4241_v53  ;;  %v2436_v25 = vmax.f32 %v2405_v57, 0.0  ;;  %v2454_v56 = vmax.f32 %v2425_v41, %v2426_v52  ;;  %v2221_v42 = vadd.f32 %v4271_v62, %v4249_v28 }
 0x247   :  { %v2410_v2 = vpop.f32.mrf.mxu1  ;;  %v2440_v57 = vmax.f32 %v2233_v47, 0.0  ;;  %v2213_v62 = vadd.f32 %v4265_v27, %v4245_v24  ;;  %v2142_v28 = vadd.f32 %v4261_v59, %v4241_v53  ;;  %v2438_v24 = vmax.f32 %v2144_v11, 0.0 }
 0x248   :  { %v2411_v32 = vadd.f32 %v2410_v2, %v4241_v53  ;;  %v2443_v26 = vmax.f32 %v2409_v58, 0.0  ;;  %v2459_v19 = vmax.f32 %v2435_v55, %v2436_v25  ;;  %v2453_v58 = vmax.f32 %v2417_v38, %v2418_v39 }
 0x249   :  { %v2432_v2 = vmax.f32 %v2227_v60, 0.0  ;;  %v2424_v5 = vmax.f32 %v2221_v42, 0.0  ;;  %v2415_v27 = vmax.f32 %v2213_v62, 0.0  ;;  %v2429_v7 = vmax.f32 %v2136_v6, 0.0  ;;  %v2485_v60 = vpop.permute.xlu0 %2484 }
 0x24a   :  { %v2444_v0 = vmax.f32 %v2411_v32, 0.0  ;;  %v2452_v32 = vmax.f32 %v2439_v9, %v2440_v57 }
 0x24b   :  { %v2451_v17 = vmax.f32 %v2431_v12, %v2432_v2  ;;  %v2450_v25 = vmax.f32 %v2423_v14, %v2424_v5  ;;  %v2449_v43 = vmax.f32 %v2415_v27, %v2416_v3  ;;  %v2638_v2 = vshrl.u32 %v2637_v23, 7 }
 0x24c   :  { %v2460_v45 = vmax.f32 %v2443_v26, %v2444_v0  ;;  %v2430_v26 = vmax.f32 %v2138_v44, 0.0  ;;  %v2437_v0 = vmax.f32 %v2142_v28, 0.0 }
 0x24d   :  { %v2639_v9 = vsub.s32 0, %v2638_v2  ;;  %v2635_v11 = vpop.permute.xlu0 %2634 }
 0x24e   :  { %3010 = vmatprep.subr.mxu0 %v2460_v45  ;;  %v2448_v53 = vmax.f32 %v2437_v0, %v2438_v24  ;;  %v2447_v59 = vmax.f32 %v2429_v7, %v2430_v26 }
 0x24f   :  { %3011 = vmatpush3.msra.mxu0 %v2460_v45  ;;  %v2640_v62 = vrot.slane %v2635_v11, %v2639_v9 }
 0x250   :  { %3012 = vmatprep.subr.mxu0 %v2459_v19 }
 0x251   :  { %3013 = vmatpush3.msra.mxu0 %v2459_v19 }
 0x252   :  { %3014 = vmatprep.subr.mxu0 %v2458_v46 }
 0x253   :  { %3015 = vmatpush3.msra.mxu0 %v2458_v46  ;;  %v2500_v46 = vpop.permute.xlu1 %2499 }
 0x254   :  { %3016 = vmatprep.subr.mxu0 %v2457_v36 }
 0x255   :  { %3017 = vmatpush3.msra.mxu0 %v2457_v36 }
 0x256   :  { %3018 = vmatprep.subr.mxu0 %v2456_v37 }
 0x257   :  { %3019 = vmatpush3.msra.mxu0 %v2456_v37  ;;  %v2490_v47 = vpop.permute.xlu1 %2489 }
 0x258   :  { %3020 = vmatprep.subr.mxu0 %v2455_v31 }
 0x259   :  { %3021 = vmatpush3.msra.mxu0 %v2455_v31 }
 0x25a   :  { %3022 = vmatprep.subr.mxu0 %v2454_v56 }
 0x25b   :  { %3023 = vmatpush3.msra.mxu0 %v2454_v56  ;;  %v2480_v56 = vpop.permute.xlu1 %2479 }
 0x25c   :  { %3024 = vmatprep.subr.mxu0 %v2453_v58 }
 0x25d   :  { %3025 = vmatpush3.msra.mxu0 %v2453_v58 }
 0x25e   :  { %3026 = vmatprep.subr.mxu0 %v2452_v32 }
 0x25f   :  { %3027 = vmatpush3.msra.mxu0 %v2452_v32 }
 0x260   :  { %3028 = vmatprep.subr.mxu0 %v2451_v17 }
 0x261   :  { %3029 = vmatpush3.msra.mxu0 %v2451_v17 }
 0x262   :  { %3030 = vmatprep.subr.mxu0 %v2450_v25 }
 0x263   :  { %3031 = vmatpush3.msra.mxu0 %v2450_v25 }
 0x264   :  { %3032 = vmatprep.subr.mxu0 %v2449_v43 }
 0x265   :  { %3033 = vmatpush3.msra.mxu0 %v2449_v43 }
 0x266   :  { %3034 = vmatprep.subr.mxu0 %v2448_v53 }
 0x267   :  { %3035 = vmatpush3.msra.mxu0 %v2448_v53 }
 0x268   :  { %3036 = vmatprep.subr.mxu0 %v2447_v59 }
 0x269   :  { %3037 = vmatpush3.msra.mxu0 %v2447_v59 }
 0x26a   :  { %3038 = vmatprep.subr.mxu0 %v4257_v50 }
 0x26b   :  { %3039 = vmatpush3.msra.mxu0 %v4257_v50  ;;  %v2465_v50 = vld [vmem:[%s4364_s5 + $0x20] sm:$0xff] }
 0x26c   :  { %3040 = vmatprep.subr.mxu0 %v4251_v33 }
 0x26d   :  { %3041 = vmatpush3.msra.mxu0 %v4251_v33  ;;  %v2467_v33 = vld [vmem:[%s4364_s5 + $0x30] sm:$0xff] }
 0x26e   :  { %3043 = vmatmul.mubr.f32.vlgmr.msra.gmra.mxu0 %v2462_v61 }
 0x26f   :  { %3045 = vmatprep.mubr.f32.mxu0 %v2463_v34 }
 0x272   :  { %3046 = vmatmul.mubr.f32.gmra.mxu0 %v2464_v13 }
 0x273   :  { %3048 = vmatprep.mubr.f32.mxu0 %v2465_v50 }
 0x276   :  { %3049 = vmatmul.mubr.f32.gmra.mxu0 %v2466_v18 }
 0x277   :  { %3051 = vmatprep.mubr.f32.mxu0 %v2467_v33 }
 0x27a   :  { %3052 = vmatmul.mubr.f32.gmra.mxu0 %v2468_v21 }
 0x32e   :  { %v3044_v55 = vpop.f32.mrf.mxu0 }
 0x32f   :  { %v2589_v15 = vadd.f32 %v3044_v55, %v2485_v60 }
 0x330   :  { %v2583_v45 = vpop.f32.mrf.mxu0 }
 0x331   :  { %v2584_v42 = vadd.f32 %v2583_v45, %v2480_v56  ;;  %v2623_v57 = vmax.f32 %v2589_v15, 0.0 }
 0x332   :  { %v3047_v20 = vpop.f32.mrf.mxu0 }
 0x333   :  { %v2599_v37 = vadd.f32 %v3047_v20, %v2495_v40  ;;  %v2622_v58 = vmax.f32 %v2584_v42, 0.0 }
 0x334   :  { %v2593_v4 = vpop.f32.mrf.mxu0 }
 0x335   :  { %v2594_v39 = vadd.f32 %v2593_v4, %v2490_v47  ;;  %v2625_v31 = vmax.f32 %v2599_v37, 0.0 }
 0x336   :  { %v3050_v19 = vpop.f32.mrf.mxu0 }
 0x337   :  { %v2609_v30 = vadd.f32 %v3050_v19, %v2505_v10  ;;  %v2624_v35 = vmax.f32 %v2594_v39, 0.0 }
 0x338   :  { %v2603_v29 = vpop.f32.mrf.mxu0 }
 0x339   :  { %v2604_v51 = vadd.f32 %v2603_v29, %v2500_v46  ;;  %v2627_v38 = vmax.f32 %v2609_v30, 0.0 }
 0x33a   :  { %v3053_v49 = vpop.f32.mrf.mxu0 }
 0x33b   :  { %v2619_v54 = vadd.f32 %v3053_v49, %v2515_v1  ;;  %v2626_v41 = vmax.f32 %v2604_v51, 0.0 }
 0x33c   :  { %v2613_v63 = vpop.f32.mrf.mxu0 }
 0x33d   :  { %v2629_v48 = vmax.f32 %v2619_v54, 0.0  ;;  %v2614_v36 = vadd.f32 %v2613_v63, %v2510_v16 }
 0x33f   :  { %v2628_v52 = vmax.f32 %v2614_v36, 0.0  ;;  %3055 = vmatpush3.msra.mxu1 %v2629_v48 }
 0x340   :  { %3056 = vmatprep.subr.mxu1 %v4395_v8 }
 0x341   :  { %3057 = vmatpush3.msra.mxu1 %v2628_v52 }
 0x342   :  { %3058 = vmatprep.subr.mxu1 %v4395_v8 }
 0x343   :  { %3059 = vmatpush3.msra.mxu1 %v2627_v38 }
 0x344   :  { %3060 = vmatprep.subr.mxu1 %v4395_v8 }
 0x345   :  { %3061 = vmatpush3.msra.mxu1 %v2626_v41 }
 0x346   :  { %3062 = vmatprep.subr.mxu1 %v4395_v8 }
 0x347   :  { %3063 = vmatpush3.msra.mxu1 %v2625_v31 }
 0x348   :  { %3064 = vmatprep.subr.mxu1 %v4395_v8 }
 0x349   :  { %3065 = vmatpush3.msra.mxu1 %v2624_v35 }
 0x34a   :  { %3066 = vmatprep.subr.mxu1 %v4395_v8 }
 0x34b   :  { %3067 = vmatpush3.msra.mxu1 %v2623_v57 }
 0x34c   :  { %3068 = vmatprep.subr.mxu1 %v4395_v8 }
 0x34d   :  { %3069 = vmatpush3.msra.mxu1 %v2622_v58 }
 0x34e   :  { %3071 = vmatmul.mubr.msk.f32.vlgmr.msra.gmra.mxu1 %vm2641_vm4, %v2630_v22 }
 0x40e   :  { %v2711_v5 = vpop.f32.mrf.mxu1 }
 0x40f   :  { %v2712_v12 = vadd.f32 %v2711_v5, %v2640_v62 }
 0x410   :  { %v3072_v32 = vpop.f32.mrf.mxu1 }
 0x411   :  { %2715 = vst [vmem:[%s4366_s9] sm:$0x1] %v2712_v12 }

</bundles_post_ra>
